<compile_context>
chip_gen: v7x
topology: tpu7x:2x2x1
jax: 0.10.0
libtpu: 0.0.40
codegen_flags: <defaults>
</compile_context>

<pallas_src>
import functools

import jax
import jax.numpy as jnp
from jax.experimental import pallas as pl
from jax.experimental.pallas import tpu as pltpu


# ------------------------- device / sizing heuristics --------------------------

def _device_kind():
    try:
        return jax.devices()[0].device_kind.lower()
    except Exception:
        return ""


def _is_v7x():
    return "v7" in _device_kind()


def _vmem_budget_bytes():
    kind = _device_kind()
    if "v7" in kind:
        return 44 << 20     # 64 MiB physical VMEM per TC on v7x -- leave headroom
    if "v5" in kind or "v6" in kind:
        return 96 << 20     # 128 MiB physical VMEM on v5e/v6e
    return 32 << 20         # conservative default for unknown chips


def _pick_s_tile(S, B, C, x_itemsize, budget_bytes, min_tiles=1):
    """Budget-driven streamed-tile size: spend up to ~1/3 of the VMEM budget on the two
    double-buffered x tiles; use the whole S (single grid step) when it fits."""
    bytes_per_elem = max(B * C * x_itemsize, 1)
    cap_elems = max(128, (budget_bytes // 6) // bytes_per_elem)
    if min_tiles > 1:
        cap_elems = min(cap_elems, max(128, S // min_tiles))
    elif S <= cap_elems:
        return S
    t = (min(cap_elems, S) // 128) * 128
    while t >= 128:
        if S % t == 0 and (S // t) % min_tiles == 0:
            return t
        t -= 128
    return S   # no lane-aligned divisor fits: fall back to a single full-S tile


def _pick_chunk(B, D, s_tile):
    """In-kernel spatial sub-chunk: keep the f32 (B, D, chunk) conv activation within
    roughly half the vreg file instead of materializing/spilling it to VMEM."""
    cap = (32 * 1024) // max(B * D, 1)
    cap = max(128, min(512, (cap // 128) * 128))
    c = cap
    while c >= 128:
        if s_tile % c == 0:
            return c
        c -= 128
    return s_tile


def _padded_bytes(shape, itemsize=4):
    s = tuple(shape)
    if len(s) == 1:
        s = (1,) + s
    lead = 1
    for d in s[:-2]:
        lead *= d
    rows = -(-s[-2] // 8) * 8
    cols = -(-s[-1] // 128) * 128
    return lead * rows * cols * itemsize


def _estimate_vmem_bytes(B, C, D, KP, s_tile, chunk, x_itemsize):
    est = 2 * _padded_bytes((B, C, s_tile), x_itemsize)                 # streamed x (2 bufs)
    est += 2 * (_padded_bytes((D, C)) + _padded_bytes((D, 1))
                + 2 * _padded_bytes((1, D)) + _padded_bytes((D, KP)))   # resident params
    est += 2 * (2 * _padded_bytes((B, D)) + _padded_bytes((B, KP)))     # outputs
    est += 2 * _padded_bytes((B, D, chunk)) + 2 * _padded_bytes((B, C, chunk))  # temps
    return est + (4 << 20)                                              # headroom


def _zero_index_map(ndim, grid_rank):
    if grid_rank == 1:
        return lambda k: (0,) * ndim
    return lambda p, k: (0,) * ndim


def _const_specs(shapes, grid_rank, single_buffer):
    specs = []
    for shape in shapes:
        idx = _zero_index_map(len(shape), grid_rank)
        if single_buffer:
            # Constant-index resident operands: no need to double-buffer them.
            specs.append(pl.BlockSpec(shape, idx, pipeline_mode=pl.Buffered(1)))
        else:
            specs.append(pl.BlockSpec(shape, idx))
    return specs


# ------------------------------- kernel bodies ----------------------------------

def _conv_relu_pool_partial(x_ref, w_ref, b_ref, chunk):
    """1x1 conv + bias + ReLU + partial spatial sum for the current (B, C, TS) tile.

    Chunked over `chunk`-lane sub-tiles so the f32 (B, D, chunk) activation stays in
    vregs; the conv is C unrolled VPU FMAs (MXU would be ~C/256 utilized and the kernel
    is memory-bound anyway).  Returns a (B, D) f32 partial pooled sum.
    """
    B, C, TS = x_ref.shape
    D = w_ref.shape[0]
    n_chunks = TS // chunk

    # Hoisted once per grid step: tiny per-channel weight columns with D on sublanes so
    # the FMA broadcast is a plain lane splat; bias as (1, D, 1).
    w = w_ref[...].astype(jnp.float32)                       # (D, C)
    w_cols = [w[:, c:c + 1][None, :, :] for c in range(C)]   # C x (1, D, 1)
    bias = b_ref[...].astype(jnp.float32)[None, :, :]        # (1, D, 1)

    def body(i, part):
        s0 = pl.multiple_of(i * chunk, chunk)
        xc = x_ref[:, :, pl.ds(s0, chunk)].astype(jnp.float32)   # (B, C, chunk) -> f32
        y = xc[:, 0:1, :] * w_cols[0]
        for c in range(1, C):                                    # C is tiny (image channels)
            y = y + xc[:, c:c + 1, :] * w_cols[c]
        y = jnp.maximum(y + bias, 0.0)                           # bias + ReLU, f32 VPU
        return part + jnp.sum(y, axis=-1)                        # (B, D) partial pool sum

    return jax.lax.fori_loop(0, n_chunks, body,
                             jnp.zeros((B, D), jnp.float32), unroll=True)


def _fused_kernel(x_ref, w_ref, b_ref, g_ref, bt_ref, wc_ref,
                  ft_ref, fb_ref, fi_ref, *, inv_s, chunk):
    # Single-core path: 1-D grid over spatial tiles ("arbitrary" reduction axis).
    # ft_ref doubles as the resident (B, D) accumulator (constant output block index).
    k = pl.program_id(0)

    @pl.when(k == 0)
    def _init():
        ft_ref[...] = jnp.zeros_like(ft_ref)

    ft_ref[...] += _conv_relu_pool_partial(x_ref, w_ref, b_ref, chunk)

    @pl.when(k == pl.num_programs(0) - 1)
    def _epilogue():
        ft = ft_ref[...] * inv_s                   # accumulate-then-scale global avg pool
        ft_ref[...] = ft
        # BatchNorm1d, training-mode batch statistics (biased variance, eps=1e-5).
        mean = jnp.mean(ft, axis=0, keepdims=True)
        var = jnp.mean((ft - mean) ** 2, axis=0, keepdims=True)
        fb = (ft - mean) * jax.lax.rsqrt(var + 1e-5) * g_ref[...] + bt_ref[...]
        fb_ref[...] = fb
        # Bias-free Linear classifier on the lane-padded width (sliced in the wrapper).
        fi_ref[...] = jnp.dot(fb, wc_ref[...], preferred_element_type=jnp.float32)


def _partial_kernel(x_ref, w_ref, b_ref, part_ref, *, chunk):
    # Split-reduction path: grid = (num_parallel, n_steps); axis 0 is "parallel" so v7x
    # can shard the spatial reduction across its two TensorCores.  Each p accumulates its
    # own (1, B, D) partial pooled sum; the tiny BN/classifier epilogue runs in the wrapper.
    k = pl.program_id(1)

    @pl.when(k == 0)
    def _init():
        part_ref[...] = jnp.zeros_like(part_ref)

    part_ref[...] += _conv_relu_pool_partial(x_ref, w_ref, b_ref, chunk)[None, :, :]


# --------------------------------- wrapper --------------------------------------

def init_params(key, c_in, out_dim, id_num):
    k1, k2, k3 = jax.random.split(key, 3)
    # Synthetic extractor: Conv2d(c_in, out_dim, 1, bias=True) (kaiming fan_in) -> ReLU -> GAP.
    conv_w = jax.random.normal(k1, (out_dim, c_in), jnp.float32) * jnp.sqrt(2.0 / c_in)
    conv_b = 0.1 * jax.random.normal(k3, (out_dim,), jnp.float32)
    bn_gamma = jnp.ones((out_dim,), jnp.float32)    # weights_init_kaiming: BN weight = 1
    bn_beta = jnp.zeros((out_dim,), jnp.float32)    # BN bias = 0 (requires_grad_(False))
    cls_w = jax.random.normal(k2, (out_dim, id_num), jnp.float32) * 0.001   # std = 0.001
    return dict(conv_w=conv_w, conv_b=conv_b, bn_gamma=bn_gamma,
                bn_beta=bn_beta, cls_w=cls_w)


def extractor_model_forward(x_nchw, params, *, s_tile=None, chunk=None, num_parallel=None):
    """ExtractorModel.forward: returns (ft, fb, fi).

    x may be streamed in float32 or bfloat16 (bf16 halves the dominant HBM traffic);
    all in-kernel math is f32.
    """
    B, C, H, W = x_nchw.shape
    S = H * W
    D = params["conv_w"].shape[0]
    K = params["cls_w"].shape[1]

    # Consume NCHW directly: merging H, W into S is a free contiguous reshape
    # (no transpose / extra HBM pass of the largest tensor).
    x_bcs = x_nchw.reshape(B, C, S)
    x_itemsize = x_bcs.dtype.itemsize

    budget = _vmem_budget_bytes()
    want_parallel = num_parallel if num_parallel is not None else (2 if _is_v7x() else 1)

    if s_tile is None:
        s_tile = _pick_s_tile(S, B, C, x_itemsize, budget,
                              min_tiles=want_parallel if want_parallel > 1 else 1)
    assert S % s_tile == 0, "spatial tile must divide H*W"
    assert s_tile == S or s_tile % 128 == 0, "s_tile must be 128-aligned or the full S"
    n_tiles = S // s_tile

    if chunk is None:
        chunk = _pick_chunk(B, D, s_tile)
    assert s_tile % chunk == 0

    num_parallel = want_parallel
    if num_parallel < 1 or n_tiles % num_parallel != 0:
        num_parallel = 1

    w_f32 = params["conv_w"].astype(jnp.float32)                  # (D, C)
    b_col = params["conv_b"].reshape(D, 1).astype(jnp.float32)    # (D, 1)
    gamma = params["bn_gamma"].reshape(1, D).astype(jnp.float32)  # (1, D)
    beta = params["bn_beta"].reshape(1, D).astype(jnp.float32)    # (1, D)

    if num_parallel == 1:
        # ------------- fused single-core path: BN + classifier epilogue in-kernel -------
        KP = ((K + 127) // 128) * 128             # lane-dense classifier output width
        wc_pad = jnp.zeros((D, KP), jnp.float32).at[:, :K].set(
            params["cls_w"].astype(jnp.float32))
        vmem_limit = int(min(budget, max(
            16 << 20, _estimate_vmem_bytes(B, C, D, KP, s_tile, chunk, x_itemsize))))
        kernel = functools.partial(_fused_kernel, inv_s=float(1.0 / S), chunk=chunk)

        def call(single_buffer):
            in_specs = [pl.BlockSpec((B, C, s_tile), lambda k: (0, 0, k))]
            in_specs += _const_specs([(D, C), (D, 1), (1, D), (1, D), (D, KP)],
                                     grid_rank=1, single_buffer=single_buffer)
            return pl.pallas_call(
                kernel,
                out_shape=(
                    jax.ShapeDtypeStruct((B, D), jnp.float32),
                    jax.ShapeDtypeStruct((B, D), jnp.float32),
                    jax.ShapeDtypeStruct((B, KP), jnp.float32),
                ),
                grid_spec=pltpu.PrefetchScalarGridSpec(
                    num_scalar_prefetch=0,
                    grid=(n_tiles,),
                    in_specs=in_specs,
                    out_specs=(
                        pl.BlockSpec((B, D), lambda k: (0, 0)),
                        pl.BlockSpec((B, D), lambda k: (0, 0)),
                        pl.BlockSpec((B, KP), lambda k: (0, 0)),
                    ),
                ),
                compiler_params=pltpu.CompilerParams(
                    dimension_semantics=("arbitrary",),        # S is a reduction axis
                    vmem_limit_bytes=vmem_limit,
                ),
            )(x_bcs, w_f32, b_col, gamma, beta, wc_pad)

        try:
            ft, fb, fi_pad = call(single_buffer=True)
        except Exception:   # pipeline_mode / Buffered(1) unsupported: default buffering
            ft, fb, fi_pad = call(single_buffer=False)
        return ft, fb, fi_pad[:, :K]

    # ------------- split-partials path (v7x: shard reduction across both TCs) -----------
    n_steps = n_tiles // num_parallel
    vmem_limit = int(min(budget, max(
        16 << 20, _estimate_vmem_bytes(B, C, D, 0, s_tile, chunk, x_itemsize))))
    kernel = functools.partial(_partial_kernel, chunk=chunk)

    def call(single_buffer):
        in_specs = [pl.BlockSpec((B, C, s_tile),
                                 lambda p, k: (0, 0, p * n_steps + k))]
        in_specs += _const_specs([(D, C), (D, 1)], grid_rank=2,
                                 single_buffer=single_buffer)
        return pl.pallas_call(
            kernel,
            out_shape=jax.ShapeDtypeStruct((num_parallel, B, D), jnp.float32),
            grid_spec=pltpu.PrefetchScalarGridSpec(
                num_scalar_prefetch=0,
                grid=(num_parallel, n_steps),
                in_specs=in_specs,
                out_specs=pl.BlockSpec((1, B, D), lambda p, k: (p, 0, 0)),
            ),
            compiler_params=pltpu.CompilerParams(
                dimension_semantics=("parallel", "arbitrary"),
                vmem_limit_bytes=vmem_limit,
            ),
        )(x_bcs, w_f32, b_col)

    try:
        parts = call(single_buffer=True)
    except Exception:
        parts = call(single_buffer=False)

    # Tiny O(B*D) epilogue in the wrapper: pool scale + BatchNorm1d (batch stats) + classifier.
    ft = jnp.sum(parts, axis=0) * (1.0 / S)
    mean = jnp.mean(ft, axis=0, keepdims=True)
    var = jnp.mean((ft - mean) ** 2, axis=0, keepdims=True)
    fb = (ft - mean) * jax.lax.rsqrt(var + 1e-5) * gamma + beta
    fi = jnp.dot(fb, params["cls_w"].astype(jnp.float32),
                 precision=jax.lax.Precision.HIGHEST)
    return ft, fb, fi


# ----------------------------- reference (plain JAX) ----------------------------

def _reference_forward(x_nchw, params):
    B, C, H, W = x_nchw.shape
    D = params["conv_w"].shape[0]
    x = x_nchw.reshape(B, C, H * W).astype(jnp.float32)
    y = jnp.einsum("dc,bcs->bds", params["conv_w"], x,
                   precision=jax.lax.Precision.HIGHEST)
    y = jnp.maximum(y + params["conv_b"].reshape(1, D, 1), 0.0)
    ft = jnp.mean(y, axis=-1)                                    # (B, D)
    mean = jnp.mean(ft, axis=0, keepdims=True)
    var = jnp.mean((ft - mean) ** 2, axis=0, keepdims=True)
    fb = (ft - mean) * jax.lax.rsqrt(var + 1e-5) * params["bn_gamma"][None] \
         + params["bn_beta"][None]
    fi = jnp.dot(fb, params["cls_w"], precision=jax.lax.Precision.HIGHEST)
    return ft, fb, fi


def _check(got, ref, atol):
    assert got.shape == ref.shape, (got.shape, ref.shape)
    err = float(jnp.max(jnp.abs(got.astype(jnp.float32) - ref.astype(jnp.float32))))
    assert err <= atol, f"max abs err {err} > {atol}"


# ------------------------------------ main --------------------------------------

if __name__ == "__main__":
    key = jax.random.PRNGKey(0)
    k_x, k_p = jax.random.split(key)

    B, C, H, W = 2, 4, 16, 16          # imgs: NCHW
    extractor_out_dim = 32
    id_num = 1                         # module default

    x = jax.random.normal(k_x, (B, C, H, W), jnp.float32)
    params = init_params(k_p, C, extractor_out_dim, id_num)
    ref = _reference_forward(x, params)
    tols = (5e-4, 2e-3, 1e-4)          # ft, fb, fi

    # 1) Default path: auto (budget-driven) tile; fused epilogue on 1-TC chips, split
    #    partials automatically on v7x.
    out = extractor_model_forward(x, params)
    jax.block_until_ready(out)
    assert out[0].shape == (B, extractor_out_dim)
    assert out[1].shape == (B, extractor_out_dim)
    assert out[2].shape == (B, id_num)
    for got, r, tol in zip(out, ref, tols):
        _check(got, r, tol)

    # 2) Fused path with a forced 2-step spatial grid (exercises accumulation + pl.when).
    out = extractor_model_forward(x, params, s_tile=128, num_parallel=1)
    jax.block_until_ready(out)
    for got, r, tol in zip(out, ref, tols):
        _check(got, r, tol)

    # 3) Split-partials path (v7x dual-TensorCore layout; also correct on 1-TC chips).
    out = extractor_model_forward(x, params, s_tile=128, num_parallel=2)
    jax.block_until_ready(out)
    for got, r, tol in zip(out, ref, tols):
        _check(got, r, tol)

    # 4) bf16-streamed input (halves HBM traffic of the dominant tensor); compare against
    #    the f32 reference evaluated on the same bf16-quantized input.
    x_bf16 = x.astype(jnp.bfloat16)
    ref_bf = _reference_forward(x_bf16.astype(jnp.float32), params)
    out = extractor_model_forward(x_bf16, params, s_tile=128, num_parallel=1)
    jax.block_until_ready(out)
    for got, r, tol in zip(out, ref_bf, tols):
        _check(got, r, tol)

    print("KERNEL_OK")
</pallas_src>

<mosaic_0001>
module attributes {stable_mosaic.version = 11 : i64} {
  func.func @_fused_kernel(%arg0: i32, %arg1: memref<2x4x256xf32, #tpu.memory_space<vmem>>, %arg2: memref<32x4xf32, #tpu.memory_space<vmem>>, %arg3: memref<32x1xf32, #tpu.memory_space<vmem>>, %arg4: memref<1x32xf32, #tpu.memory_space<vmem>>, %arg5: memref<1x32xf32, #tpu.memory_space<vmem>>, %arg6: memref<32x128xf32, #tpu.memory_space<vmem>>, %arg7: memref<2x32xf32, #tpu.memory_space<vmem>>, %arg8: memref<2x32xf32, #tpu.memory_space<vmem>>, %arg9: memref<2x128xf32, #tpu.memory_space<vmem>>) attributes {dimension_semantics = [#tpu.dimension_semantics<arbitrary>], iteration_bounds = array<i64: 1>, scalar_prefetch = 0 : i64, scratch_operands = 0 : i64, tpu.core_type = #tpu.core_type<tc>, window_params = [{transform_indices = @transform_0, window_bounds = array<i64: 2, 4, 256>}, {pipeline_mode = #tpu.pipeline_mode<synchronous>, transform_indices = @transform_1, window_bounds = array<i64: 32, 4>}, {pipeline_mode = #tpu.pipeline_mode<synchronous>, transform_indices = @transform_2, window_bounds = array<i64: 32, 1>}, {pipeline_mode = #tpu.pipeline_mode<synchronous>, transform_indices = @transform_3, window_bounds = array<i64: 1, 32>}, {pipeline_mode = #tpu.pipeline_mode<synchronous>, transform_indices = @transform_4, window_bounds = array<i64: 1, 32>}, {pipeline_mode = #tpu.pipeline_mode<synchronous>, transform_indices = @transform_5, window_bounds = array<i64: 32, 128>}, {pipeline_mode = #tpu.pipeline_mode<synchronous>, transform_indices = @transform_6, window_bounds = array<i64: 2, 32>}, {pipeline_mode = #tpu.pipeline_mode<synchronous>, transform_indices = @transform_7, window_bounds = array<i64: 2, 32>}, {pipeline_mode = #tpu.pipeline_mode<synchronous>, transform_indices = @transform_8, window_bounds = array<i64: 2, 128>}]} {
    %c0_i32 = arith.constant 0 : i32
    %0 = arith.cmpi eq, %arg0, %c0_i32 : i32
    %1 = arith.extui %0 : i1 to i32
    %c0_i32_0 = arith.constant 0 : i32
    %2 = arith.cmpi ne, %1, %c0_i32_0 : i32
    scf.if %2 {
      %cst_15 = arith.constant 0.000000e+00 : f32
      %50 = vector.broadcast %cst_15 : f32 to vector<2x32xf32>
      %c0_16 = arith.constant 0 : index
      %c0_17 = arith.constant 0 : index
      %51 = vector.load %arg7[%c0_16, %c0_17] : memref<2x32xf32, #tpu.memory_space<vmem>>, vector<2x32xf32>
      tpu.vector_store %arg7[%c0_16, %c0_17], %50 {strides = array<i32>} : memref<2x32xf32, #tpu.memory_space<vmem>>, vector<2x32xf32>,
    } else {
    }
    %c0 = arith.constant 0 : index
    %c0_1 = arith.constant 0 : index
    %3 = vector.load %arg7[%c0, %c0_1] : memref<2x32xf32, #tpu.memory_space<vmem>>, vector<2x32xf32>
    %c0_2 = arith.constant 0 : index
    %c0_3 = arith.constant 0 : index
    %4 = vector.load %arg2[%c0_2, %c0_3] : memref<32x4xf32, #tpu.memory_space<vmem>>, vector<32x4xf32>
    %5 = vector.extract_strided_slice %4 {offsets = [0, 0], sizes = [32, 1], strides = [1, 1]} : vector<32x4xf32> to vector<32x1xf32>
    %6 = vector.shape_cast %5 : vector<32x1xf32> to vector<1x32x1xf32>
    %7 = vector.extract_strided_slice %4 {offsets = [0, 1], sizes = [32, 1], strides = [1, 1]} : vector<32x4xf32> to vector<32x1xf32>
    %8 = vector.shape_cast %7 : vector<32x1xf32> to vector<1x32x1xf32>
    %9 = vector.extract_strided_slice %4 {offsets = [0, 2], sizes = [32, 1], strides = [1, 1]} : vector<32x4xf32> to vector<32x1xf32>
    %10 = vector.shape_cast %9 : vector<32x1xf32> to vector<1x32x1xf32>
    %11 = vector.extract_strided_slice %4 {offsets = [0, 3], sizes = [32, 1], strides = [1, 1]} : vector<32x4xf32> to vector<32x1xf32>
    %12 = vector.shape_cast %11 : vector<32x1xf32> to vector<1x32x1xf32>
    %c0_4 = arith.constant 0 : index
    %c0_5 = arith.constant 0 : index
    %13 = vector.load %arg3[%c0_4, %c0_5] : memref<32x1xf32, #tpu.memory_space<vmem>>, vector<32x1xf32>
    %14 = vector.shape_cast %13 : vector<32x1xf32> to vector<1x32x1xf32>
    %cst = arith.constant 0.000000e+00 : f32
    %15 = vector.broadcast %cst : f32 to vector<2x32xf32>
    %c0_i32_6 = arith.constant 0 : i32
    %c256_i32 = arith.constant 256 : i32
    %16 = arith.muli %c0_i32_6, %c256_i32 : i32
    %17 = tpu.assume_multiple %16, 256 : i32
    %c0_7 = arith.constant 0 : index
    %c0_8 = arith.constant 0 : index
    %18 = arith.index_cast %17 : i32 to index
    %19 = vector.load %arg1[%c0_7, %c0_8, %18] : memref<2x4x256xf32, #tpu.memory_space<vmem>>, vector<2x4x256xf32>
    %20 = vector.extract_strided_slice %19 {offsets = [0, 0, 0], sizes = [2, 1, 256], strides = [1, 1, 1]} : vector<2x4x256xf32> to vector<2x1x256xf32>
    %21 = vector.broadcast %20 : vector<2x1x256xf32> to vector<2x32x256xf32>
    %22 = vector.broadcast %6 : vector<1x32x1xf32> to vector<2x32x256xf32>
    %23 = arith.mulf %21, %22 : vector<2x32x256xf32>
    %24 = vector.extract_strided_slice %19 {offsets = [0, 1, 0], sizes = [2, 1, 256], strides = [1, 1, 1]} : vector<2x4x256xf32> to vector<2x1x256xf32>
    %25 = vector.broadcast %24 : vector<2x1x256xf32> to vector<2x32x256xf32>
    %26 = vector.broadcast %8 : vector<1x32x1xf32> to vector<2x32x256xf32>
    %27 = arith.mulf %25, %26 : vector<2x32x256xf32>
    %28 = arith.addf %23, %27 : vector<2x32x256xf32>
    %29 = vector.extract_strided_slice %19 {offsets = [0, 2, 0], sizes = [2, 1, 256], strides = [1, 1, 1]} : vector<2x4x256xf32> to vector<2x1x256xf32>
    %30 = vector.broadcast %29 : vector<2x1x256xf32> to vector<2x32x256xf32>
    %31 = vector.broadcast %10 : vector<1x32x1xf32> to vector<2x32x256xf32>
    %32 = arith.mulf %30, %31 : vector<2x32x256xf32>
    %33 = arith.addf %28, %32 : vector<2x32x256xf32>
    %34 = vector.extract_strided_slice %19 {offsets = [0, 3, 0], sizes = [2, 1, 256], strides = [1, 1, 1]} : vector<2x4x256xf32> to vector<2x1x256xf32>
    %35 = vector.broadcast %34 : vector<2x1x256xf32> to vector<2x32x256xf32>
    %36 = vector.broadcast %12 : vector<1x32x1xf32> to vector<2x32x256xf32>
    %37 = arith.mulf %35, %36 : vector<2x32x256xf32>
    %38 = arith.addf %33, %37 : vector<2x32x256xf32>
    %39 = vector.broadcast %14 : vector<1x32x1xf32> to vector<2x32x256xf32>
    %40 = arith.addf %38, %39 : vector<2x32x256xf32>
    %cst_9 = arith.constant 0.000000e+00 : f32
    %41 = vector.broadcast %cst_9 : f32 to vector<2x32x256xf32>
    %42 = arith.maximumf %40, %41 : vector<2x32x256xf32>
    %cst_10 = arith.constant dense<0.000000e+00> : vector<2x32xf32>
    %43 = vector.multi_reduction <add>, %42, %cst_10 [2] : vector<2x32x256xf32> to vector<2x32xf32>
    %44 = arith.addf %15, %43 : vector<2x32xf32>
    %c1_i32 = arith.constant 1 : i32
    %45 = arith.addf %3, %44 : vector<2x32xf32>
    %c0_11 = arith.constant 0 : index
    %c0_12 = arith.constant 0 : index
    %46 = vector.load %arg7[%c0_11, %c0_12] : memref<2x32xf32, #tpu.memory_space<vmem>>, vector<2x32xf32>
    tpu.vector_store %arg7[%c0_11, %c0_12], %45 {strides = array<i32>} : memref<2x32xf32, #tpu.memory_space<vmem>>, vector<2x32xf32>,
    %c0_i32_13 = arith.constant 0 : i32
    %47 = arith.cmpi eq, %arg0, %c0_i32_13 : i32
    %48 = arith.extui %47 : i1 to i32
    %c0_i32_14 = arith.constant 0 : i32
    %49 = arith.cmpi ne, %48, %c0_i32_14 : i32
    scf.if %49 {
      %c0_15 = arith.constant 0 : index
      %c0_16 = arith.constant 0 : index
      %50 = vector.load %arg7[%c0_15, %c0_16] : memref<2x32xf32, #tpu.memory_space<vmem>>, vector<2x32xf32>
      %cst_17 = arith.constant 3.906250e-03 : f32
      %51 = vector.broadcast %cst_17 : f32 to vector<2x32xf32>
      %52 = arith.mulf %50, %51 : vector<2x32xf32>
      %c0_18 = arith.constant 0 : index
      %c0_19 = arith.constant 0 : index
      %53 = vector.load %arg7[%c0_18, %c0_19] : memref<2x32xf32, #tpu.memory_space<vmem>>, vector<2x32xf32>
      tpu.vector_store %arg7[%c0_18, %c0_19], %52 {strides = array<i32>} : memref<2x32xf32, #tpu.memory_space<vmem>>, vector<2x32xf32>,
      %cst_20 = arith.constant dense<0.000000e+00> : vector<32xf32>
      %54 = vector.multi_reduction <add>, %52, %cst_20 [0] : vector<2x32xf32> to vector<32xf32>
      %55 = vector.shape_cast %54 : vector<32xf32> to vector<1x32xf32>
      %cst_21 = arith.constant 2.000000e+00 : f32
      %56 = vector.broadcast %cst_21 : f32 to vector<1x32xf32>
      %57 = arith.divf %55, %56 : vector<1x32xf32>
      %58 = vector.broadcast %57 : vector<1x32xf32> to vector<2x32xf32>
      %59 = arith.subf %52, %58 : vector<2x32xf32>
      %60 = arith.mulf %59, %59 : vector<2x32xf32>
      %cst_22 = arith.constant dense<0.000000e+00> : vector<32xf32>
      %61 = vector.multi_reduction <add>, %60, %cst_22 [0] : vector<2x32xf32> to vector<32xf32>
      %62 = vector.shape_cast %61 : vector<32xf32> to vector<1x32xf32>
      %cst_23 = arith.constant 2.000000e+00 : f32
      %63 = vector.broadcast %cst_23 : f32 to vector<1x32xf32>
      %64 = arith.divf %62, %63 : vector<1x32xf32>
      %65 = vector.broadcast %57 : vector<1x32xf32> to vector<2x32xf32>
      %66 = arith.subf %52, %65 : vector<2x32xf32>
      %cst_24 = arith.constant 9.99999974E-6 : f32
      %67 = vector.broadcast %cst_24 : f32 to vector<1x32xf32>
      %68 = arith.addf %64, %67 : vector<1x32xf32>
      %69 = math.rsqrt %68 : vector<1x32xf32>
      %70 = vector.broadcast %69 : vector<1x32xf32> to vector<2x32xf32>
      %71 = arith.mulf %66, %70 : vector<2x32xf32>
      %c0_25 = arith.constant 0 : index
      %c0_26 = arith.constant 0 : index
      %72 = vector.load %arg4[%c0_25, %c0_26] : memref<1x32xf32, #tpu.memory_space<vmem>>, vector<1x32xf32>
      %73 = vector.broadcast %72 : vector<1x32xf32> to vector<2x32xf32>
      %74 = arith.mulf %71, %73 : vector<2x32xf32>
      %c0_27 = arith.constant 0 : index
      %c0_28 = arith.constant 0 : index
      %75 = vector.load %arg5[%c0_27, %c0_28] : memref<1x32xf32, #tpu.memory_space<vmem>>, vector<1x32xf32>
      %76 = vector.broadcast %75 : vector<1x32xf32> to vector<2x32xf32>
      %77 = arith.addf %74, %76 : vector<2x32xf32>
      %c0_29 = arith.constant 0 : index
      %c0_30 = arith.constant 0 : index
      %78 = vector.load %arg8[%c0_29, %c0_30] : memref<2x32xf32, #tpu.memory_space<vmem>>, vector<2x32xf32>
      tpu.vector_store %arg8[%c0_29, %c0_30], %77 {strides = array<i32>} : memref<2x32xf32, #tpu.memory_space<vmem>>, vector<2x32xf32>,
      %c0_31 = arith.constant 0 : index
      %c0_32 = arith.constant 0 : index
      %79 = vector.load %arg6[%c0_31, %c0_32] : memref<32x128xf32, #tpu.memory_space<vmem>>, vector<32x128xf32>
      %cst_33 = arith.constant dense<0.000000e+00> : vector<2x128xf32>
      %80 = tpu.matmul %77, %79, %cst_33 {dimension_numbers = #tpu.dot_dimension_numbers<[1], [0], [0], [1], [0, 0, 1, 1], [], []>} : vector<2x32xf32>, vector<32x128xf32>, vector<2x128xf32> -> vector<2x128xf32>
      %c0_34 = arith.constant 0 : index
      %c0_35 = arith.constant 0 : index
      %81 = vector.load %arg9[%c0_34, %c0_35] : memref<2x128xf32, #tpu.memory_space<vmem>>, vector<2x128xf32>
      tpu.vector_store %arg9[%c0_34, %c0_35], %80 {strides = array<i32>} : memref<2x128xf32, #tpu.memory_space<vmem>>, vector<2x128xf32>,
    } else {
    }
    return
  }
  func.func @transform_0(%arg0: i32) -> (i32, i32, i32) {
    %c0_i32 = arith.constant 0 : i32
    %c0_i32_0 = arith.constant 0 : i32
    %c0_i32_1 = arith.constant 0 : i32
    return %c0_i32, %c0_i32_0, %arg0 : i32, i32, i32
  }
  func.func @transform_1(%arg0: i32) -> (i32, i32) {
    %c0_i32 = arith.constant 0 : i32
    %c0_i32_0 = arith.constant 0 : i32
    %c0_i32_1 = arith.constant 0 : i32
    return %c0_i32, %c0_i32_0 : i32, i32
  }
  func.func @transform_2(%arg0: i32) -> (i32, i32) {
    %c0_i32 = arith.constant 0 : i32
    %c0_i32_0 = arith.constant 0 : i32
    %c0_i32_1 = arith.constant 0 : i32
    return %c0_i32, %c0_i32_0 : i32, i32
  }
  func.func @transform_3(%arg0: i32) -> (i32, i32) {
    %c0_i32 = arith.constant 0 : i32
    %c0_i32_0 = arith.constant 0 : i32
    %c0_i32_1 = arith.constant 0 : i32
    return %c0_i32, %c0_i32_0 : i32, i32
  }
  func.func @transform_4(%arg0: i32) -> (i32, i32) {
    %c0_i32 = arith.constant 0 : i32
    %c0_i32_0 = arith.constant 0 : i32
    %c0_i32_1 = arith.constant 0 : i32
    return %c0_i32, %c0_i32_0 : i32, i32
  }
  func.func @transform_5(%arg0: i32) -> (i32, i32) {
    %c0_i32 = arith.constant 0 : i32
    %c0_i32_0 = arith.constant 0 : i32
    %c0_i32_1 = arith.constant 0 : i32
    return %c0_i32, %c0_i32_0 : i32, i32
  }
  func.func @transform_6(%arg0: i32) -> (i32, i32) {
    %c0_i32 = arith.constant 0 : i32
    %c0_i32_0 = arith.constant 0 : i32
    %c0_i32_1 = arith.constant 0 : i32
    return %c0_i32, %c0_i32_0 : i32, i32
  }
  func.func @transform_7(%arg0: i32) -> (i32, i32) {
    %c0_i32 = arith.constant 0 : i32
    %c0_i32_0 = arith.constant 0 : i32
    %c0_i32_1 = arith.constant 0 : i32
    return %c0_i32, %c0_i32_0 : i32, i32
  }
  func.func @transform_8(%arg0: i32) -> (i32, i32) {
    %c0_i32 = arith.constant 0 : i32
    %c0_i32_0 = arith.constant 0 : i32
    %c0_i32_1 = arith.constant 0 : i32
    return %c0_i32, %c0_i32_0 : i32, i32
  }
}

module attributes {stable_mosaic.version = 11 : i64} {
  func.func @_fused_kernel(%arg0: i32, %arg1: memref<2x4x256xf32, #tpu.memory_space<vmem>>, %arg2: memref<32x4xf32, #tpu.memory_space<vmem>>, %arg3: memref<32x1xf32, #tpu.memory_space<vmem>>, %arg4: memref<1x32xf32, #tpu.memory_space<vmem>>, %arg5: memref<1x32xf32, #tpu.memory_space<vmem>>, %arg6: memref<32x128xf32, #tpu.memory_space<vmem>>, %arg7: memref<2x32xf32, #tpu.memory_space<vmem>>, %arg8: memref<2x32xf32, #tpu.memory_space<vmem>>, %arg9: memref<2x128xf32, #tpu.memory_space<vmem>>) attributes {dimension_semantics = [#tpu.dimension_semantics<arbitrary>], iteration_bounds = array<i64: 1>, scalar_prefetch = 0 : i64, scratch_operands = 0 : i64, tpu.core_type = #tpu.core_type<tc>, window_params = [{transform_indices = @transform_0, window_bounds = array<i64: 2, 4, 256>}, {pipeline_mode = #tpu.pipeline_mode<synchronous>, transform_indices = @transform_1, window_bounds = array<i64: 32, 4>}, {pipeline_mode = #tpu.pipeline_mode<synchronous>, transform_indices = @transform_2, window_bounds = array<i64: 32, 1>}, {pipeline_mode = #tpu.pipeline_mode<synchronous>, transform_indices = @transform_3, window_bounds = array<i64: 1, 32>}, {pipeline_mode = #tpu.pipeline_mode<synchronous>, transform_indices = @transform_4, window_bounds = array<i64: 1, 32>}, {pipeline_mode = #tpu.pipeline_mode<synchronous>, transform_indices = @transform_5, window_bounds = array<i64: 32, 128>}, {pipeline_mode = #tpu.pipeline_mode<synchronous>, transform_indices = @transform_6, window_bounds = array<i64: 2, 32>}, {pipeline_mode = #tpu.pipeline_mode<synchronous>, transform_indices = @transform_7, window_bounds = array<i64: 2, 32>}, {pipeline_mode = #tpu.pipeline_mode<synchronous>, transform_indices = @transform_8, window_bounds = array<i64: 2, 128>}]} {
    %c0_i32 = arith.constant 0 : i32
    %0 = arith.cmpi eq, %arg0, %c0_i32 : i32
    %1 = arith.extui %0 : i1 to i32
    %c0_i32_0 = arith.constant 0 : i32
    %2 = arith.cmpi ne, %1, %c0_i32_0 : i32
    scf.if %2 {
      %cst_15 = arith.constant 0.000000e+00 : f32
      %50 = vector.broadcast %cst_15 : f32 to vector<2x32xf32>
      %c0_16 = arith.constant 0 : index
      %c0_17 = arith.constant 0 : index
      %51 = vector.load %arg7[%c0_16, %c0_17] : memref<2x32xf32, #tpu.memory_space<vmem>>, vector<2x32xf32>
      tpu.vector_store %arg7[%c0_16, %c0_17], %50 {strides = array<i32>} : memref<2x32xf32, #tpu.memory_space<vmem>>, vector<2x32xf32>,
    } else {
    }
    %c0 = arith.constant 0 : index
    %c0_1 = arith.constant 0 : index
    %3 = vector.load %arg7[%c0, %c0_1] : memref<2x32xf32, #tpu.memory_space<vmem>>, vector<2x32xf32>
    %c0_2 = arith.constant 0 : index
    %c0_3 = arith.constant 0 : index
    %4 = vector.load %arg2[%c0_2, %c0_3] : memref<32x4xf32, #tpu.memory_space<vmem>>, vector<32x4xf32>
    %5 = vector.extract_strided_slice %4 {offsets = [0, 0], sizes = [32, 1], strides = [1, 1]} : vector<32x4xf32> to vector<32x1xf32>
    %6 = vector.shape_cast %5 : vector<32x1xf32> to vector<1x32x1xf32>
    %7 = vector.extract_strided_slice %4 {offsets = [0, 1], sizes = [32, 1], strides = [1, 1]} : vector<32x4xf32> to vector<32x1xf32>
    %8 = vector.shape_cast %7 : vector<32x1xf32> to vector<1x32x1xf32>
    %9 = vector.extract_strided_slice %4 {offsets = [0, 2], sizes = [32, 1], strides = [1, 1]} : vector<32x4xf32> to vector<32x1xf32>
    %10 = vector.shape_cast %9 : vector<32x1xf32> to vector<1x32x1xf32>
    %11 = vector.extract_strided_slice %4 {offsets = [0, 3], sizes = [32, 1], strides = [1, 1]} : vector<32x4xf32> to vector<32x1xf32>
    %12 = vector.shape_cast %11 : vector<32x1xf32> to vector<1x32x1xf32>
    %c0_4 = arith.constant 0 : index
    %c0_5 = arith.constant 0 : index
    %13 = vector.load %arg3[%c0_4, %c0_5] : memref<32x1xf32, #tpu.memory_space<vmem>>, vector<32x1xf32>
    %14 = vector.shape_cast %13 : vector<32x1xf32> to vector<1x32x1xf32>
    %cst = arith.constant 0.000000e+00 : f32
    %15 = vector.broadcast %cst : f32 to vector<2x32xf32>
    %c0_i32_6 = arith.constant 0 : i32
    %c256_i32 = arith.constant 256 : i32
    %16 = arith.muli %c0_i32_6, %c256_i32 : i32
    %17 = tpu.assume_multiple %16, 256 : i32
    %c0_7 = arith.constant 0 : index
    %c0_8 = arith.constant 0 : index
    %18 = arith.index_cast %17 : i32 to index
    %19 = vector.load %arg1[%c0_7, %c0_8, %18] : memref<2x4x256xf32, #tpu.memory_space<vmem>>, vector<2x4x256xf32>
    %20 = vector.extract_strided_slice %19 {offsets = [0, 0, 0], sizes = [2, 1, 256], strides = [1, 1, 1]} : vector<2x4x256xf32> to vector<2x1x256xf32>
    %21 = vector.broadcast %20 : vector<2x1x256xf32> to vector<2x32x256xf32>
    %22 = vector.broadcast %6 : vector<1x32x1xf32> to vector<2x32x256xf32>
    %23 = arith.mulf %21, %22 : vector<2x32x256xf32>
    %24 = vector.extract_strided_slice %19 {offsets = [0, 1, 0], sizes = [2, 1, 256], strides = [1, 1, 1]} : vector<2x4x256xf32> to vector<2x1x256xf32>
    %25 = vector.broadcast %24 : vector<2x1x256xf32> to vector<2x32x256xf32>
    %26 = vector.broadcast %8 : vector<1x32x1xf32> to vector<2x32x256xf32>
    %27 = arith.mulf %25, %26 : vector<2x32x256xf32>
    %28 = arith.addf %23, %27 : vector<2x32x256xf32>
    %29 = vector.extract_strided_slice %19 {offsets = [0, 2, 0], sizes = [2, 1, 256], strides = [1, 1, 1]} : vector<2x4x256xf32> to vector<2x1x256xf32>
    %30 = vector.broadcast %29 : vector<2x1x256xf32> to vector<2x32x256xf32>
    %31 = vector.broadcast %10 : vector<1x32x1xf32> to vector<2x32x256xf32>
    %32 = arith.mulf %30, %31 : vector<2x32x256xf32>
    %33 = arith.addf %28, %32 : vector<2x32x256xf32>
    %34 = vector.extract_strided_slice %19 {offsets = [0, 3, 0], sizes = [2, 1, 256], strides = [1, 1, 1]} : vector<2x4x256xf32> to vector<2x1x256xf32>
    %35 = vector.broadcast %34 : vector<2x1x256xf32> to vector<2x32x256xf32>
    %36 = vector.broadcast %12 : vector<1x32x1xf32> to vector<2x32x256xf32>
    %37 = arith.mulf %35, %36 : vector<2x32x256xf32>
    %38 = arith.addf %33, %37 : vector<2x32x256xf32>
    %39 = vector.broadcast %14 : vector<1x32x1xf32> to vector<2x32x256xf32>
    %40 = arith.addf %38, %39 : vector<2x32x256xf32>
    %cst_9 = arith.constant 0.000000e+00 : f32
    %41 = vector.broadcast %cst_9 : f32 to vector<2x32x256xf32>
    %42 = arith.maximumf %40, %41 : vector<2x32x256xf32>
    %cst_10 = arith.constant dense<0.000000e+00> : vector<2x32xf32>
    %43 = vector.multi_reduction <add>, %42, %cst_10 [2] : vector<2x32x256xf32> to vector<2x32xf32>
    %44 = arith.addf %15, %43 : vector<2x32xf32>
    %c1_i32 = arith.constant 1 : i32
    %45 = arith.addf %3, %44 : vector<2x32xf32>
    %c0_11 = arith.constant 0 : index
    %c0_12 = arith.constant 0 : index
    %46 = vector.load %arg7[%c0_11, %c0_12] : memref<2x32xf32, #tpu.memory_space<vmem>>, vector<2x32xf32>
    tpu.vector_store %arg7[%c0_11, %c0_12], %45 {strides = array<i32>} : memref<2x32xf32, #tpu.memory_space<vmem>>, vector<2x32xf32>,
    %c0_i32_13 = arith.constant 0 : i32
    %47 = arith.cmpi eq, %arg0, %c0_i32_13 : i32
    %48 = arith.extui %47 : i1 to i32
    %c0_i32_14 = arith.constant 0 : i32
    %49 = arith.cmpi ne, %48, %c0_i32_14 : i32
    scf.if %49 {
      %c0_15 = arith.constant 0 : index
      %c0_16 = arith.constant 0 : index
      %50 = vector.load %arg7[%c0_15, %c0_16] : memref<2x32xf32, #tpu.memory_space<vmem>>, vector<2x32xf32>
      %cst_17 = arith.constant 3.906250e-03 : f32
      %51 = vector.broadcast %cst_17 : f32 to vector<2x32xf32>
      %52 = arith.mulf %50, %51 : vector<2x32xf32>
      %c0_18 = arith.constant 0 : index
      %c0_19 = arith.constant 0 : index
      %53 = vector.load %arg7[%c0_18, %c0_19] : memref<2x32xf32, #tpu.memory_space<vmem>>, vector<2x32xf32>
      tpu.vector_store %arg7[%c0_18, %c0_19], %52 {strides = array<i32>} : memref<2x32xf32, #tpu.memory_space<vmem>>, vector<2x32xf32>,
      %cst_20 = arith.constant dense<0.000000e+00> : vector<32xf32>
      %54 = vector.multi_reduction <add>, %52, %cst_20 [0] : vector<2x32xf32> to vector<32xf32>
      %55 = vector.shape_cast %54 : vector<32xf32> to vector<1x32xf32>
      %cst_21 = arith.constant 2.000000e+00 : f32
      %56 = vector.broadcast %cst_21 : f32 to vector<1x32xf32>
      %57 = arith.divf %55, %56 : vector<1x32xf32>
      %58 = vector.broadcast %57 : vector<1x32xf32> to vector<2x32xf32>
      %59 = arith.subf %52, %58 : vector<2x32xf32>
      %60 = arith.mulf %59, %59 : vector<2x32xf32>
      %cst_22 = arith.constant dense<0.000000e+00> : vector<32xf32>
      %61 = vector.multi_reduction <add>, %60, %cst_22 [0] : vector<2x32xf32> to vector<32xf32>
      %62 = vector.shape_cast %61 : vector<32xf32> to vector<1x32xf32>
      %cst_23 = arith.constant 2.000000e+00 : f32
      %63 = vector.broadcast %cst_23 : f32 to vector<1x32xf32>
      %64 = arith.divf %62, %63 : vector<1x32xf32>
      %65 = vector.broadcast %57 : vector<1x32xf32> to vector<2x32xf32>
      %66 = arith.subf %52, %65 : vector<2x32xf32>
      %cst_24 = arith.constant 9.99999974E-6 : f32
      %67 = vector.broadcast %cst_24 : f32 to vector<1x32xf32>
      %68 = arith.addf %64, %67 : vector<1x32xf32>
      %69 = math.rsqrt %68 : vector<1x32xf32>
      %70 = vector.broadcast %69 : vector<1x32xf32> to vector<2x32xf32>
      %71 = arith.mulf %66, %70 : vector<2x32xf32>
      %c0_25 = arith.constant 0 : index
      %c0_26 = arith.constant 0 : index
      %72 = vector.load %arg4[%c0_25, %c0_26] : memref<1x32xf32, #tpu.memory_space<vmem>>, vector<1x32xf32>
      %73 = vector.broadcast %72 : vector<1x32xf32> to vector<2x32xf32>
      %74 = arith.mulf %71, %73 : vector<2x32xf32>
      %c0_27 = arith.constant 0 : index
      %c0_28 = arith.constant 0 : index
      %75 = vector.load %arg5[%c0_27, %c0_28] : memref<1x32xf32, #tpu.memory_space<vmem>>, vector<1x32xf32>
      %76 = vector.broadcast %75 : vector<1x32xf32> to vector<2x32xf32>
      %77 = arith.addf %74, %76 : vector<2x32xf32>
      %c0_29 = arith.constant 0 : index
      %c0_30 = arith.constant 0 : index
      %78 = vector.load %arg8[%c0_29, %c0_30] : memref<2x32xf32, #tpu.memory_space<vmem>>, vector<2x32xf32>
      tpu.vector_store %arg8[%c0_29, %c0_30], %77 {strides = array<i32>} : memref<2x32xf32, #tpu.memory_space<vmem>>, vector<2x32xf32>,
      %c0_31 = arith.constant 0 : index
      %c0_32 = arith.constant 0 : index
      %79 = vector.load %arg6[%c0_31, %c0_32] : memref<32x128xf32, #tpu.memory_space<vmem>>, vector<32x128xf32>
      %cst_33 = arith.constant dense<0.000000e+00> : vector<2x128xf32>
      %80 = tpu.matmul %77, %79, %cst_33 {dimension_numbers = #tpu.dot_dimension_numbers<[1], [0], [0], [1], [0, 0, 1, 1], [], []>} : vector<2x32xf32>, vector<32x128xf32>, vector<2x128xf32> -> vector<2x128xf32>
      %c0_34 = arith.constant 0 : index
      %c0_35 = arith.constant 0 : index
      %81 = vector.load %arg9[%c0_34, %c0_35] : memref<2x128xf32, #tpu.memory_space<vmem>>, vector<2x128xf32>
      tpu.vector_store %arg9[%c0_34, %c0_35], %80 {strides = array<i32>} : memref<2x128xf32, #tpu.memory_space<vmem>>, vector<2x128xf32>,
    } else {
    }
    return
  }
  func.func @transform_0(%arg0: i32) -> (i32, i32, i32) {
    %c0_i32 = arith.constant 0 : i32
    %c0_i32_0 = arith.constant 0 : i32
    %c0_i32_1 = arith.constant 0 : i32
    return %c0_i32, %c0_i32_0, %arg0 : i32, i32, i32
  }
  func.func @transform_1(%arg0: i32) -> (i32, i32) {
    %c0_i32 = arith.constant 0 : i32
    %c0_i32_0 = arith.constant 0 : i32
    %c0_i32_1 = arith.constant 0 : i32
    return %c0_i32, %c0_i32_0 : i32, i32
  }
  func.func @transform_2(%arg0: i32) -> (i32, i32) {
    %c0_i32 = arith.constant 0 : i32
    %c0_i32_0 = arith.constant 0 : i32
    %c0_i32_1 = arith.constant 0 : i32
    return %c0_i32, %c0_i32_0 : i32, i32
  }
  func.func @transform_3(%arg0: i32) -> (i32, i32) {
    %c0_i32 = arith.constant 0 : i32
    %c0_i32_0 = arith.constant 0 : i32
    %c0_i32_1 = arith.constant 0 : i32
    return %c0_i32, %c0_i32_0 : i32, i32
  }
  func.func @transform_4(%arg0: i32) -> (i32, i32) {
    %c0_i32 = arith.constant 0 : i32
    %c0_i32_0 = arith.constant 0 : i32
    %c0_i32_1 = arith.constant 0 : i32
    return %c0_i32, %c0_i32_0 : i32, i32
  }
  func.func @transform_5(%arg0: i32) -> (i32, i32) {
    %c0_i32 = arith.constant 0 : i32
    %c0_i32_0 = arith.constant 0 : i32
    %c0_i32_1 = arith.constant 0 : i32
    return %c0_i32, %c0_i32_0 : i32, i32
  }
  func.func @transform_6(%arg0: i32) -> (i32, i32) {
    %c0_i32 = arith.constant 0 : i32
    %c0_i32_0 = arith.constant 0 : i32
    %c0_i32_1 = arith.constant 0 : i32
    return %c0_i32, %c0_i32_0 : i32, i32
  }
  func.func @transform_7(%arg0: i32) -> (i32, i32) {
    %c0_i32 = arith.constant 0 : i32
    %c0_i32_0 = arith.constant 0 : i32
    %c0_i32_1 = arith.constant 0 : i32
    return %c0_i32, %c0_i32_0 : i32, i32
  }
  func.func @transform_8(%arg0: i32) -> (i32, i32) {
    %c0_i32 = arith.constant 0 : i32
    %c0_i32_0 = arith.constant 0 : i32
    %c0_i32_1 = arith.constant 0 : i32
    return %c0_i32, %c0_i32_0 : i32, i32
  }
}

</mosaic_0001>

<bundles_post_ra>
// kernel: tpu_custom_call.1
= control target key start
LH: loop header
LB: loop body
LE: loop exit
PB: predicated region body
PF: predicated region fallthrough
CT: control target
= control target key end

     0   :  { %14 = vsyncpa [#allocation3], 0  ;;  %v794_v1 = vmov 2   ;;  %v795_v2 = vmov 1   ;;  %s1060_s0 = inlined_call_operand.vmem [shape: f32[2,4,256], index: 0, kind: input, shape index: {}]   ;;  %s1061_s1 = inlined_call_operand.vmem [shape: f32[32,4], index: 1, kind: input, shape index: {}]   ;;  %s1062_s2 = inlined_call_operand.vmem [shape: f32[32,1], index: 2, kind: input, shape index: {}]   ;;  %s1063_s3 = inlined_call_operand.vmem [shape: f32[1,32], index: 3, kind: input, shape index: {}]   ;;  %s1064_s4 = inlined_call_operand.vmem [shape: f32[1,32], index: 4, kind: input, shape index: {}]   ;;  %s1065_s5 = inlined_call_operand.vmem [shape: f32[32,128], index: 5, kind: input, shape index: {}]   ;;  %s1066_s6 = inlined_call_operand.hbm [shape: f32[2,32], index: 6, kind: output, shape index: {0}]   ;;  %s1067_s7 = inlined_call_operand.hbm [shape: f32[2,32], index: 7, kind: output, shape index: {1}]   ;;  %s1068_s8 = inlined_call_operand.hbm [shape: f32[2,128], index: 8, kind: output, shape index: {2}]  }
   0x1   :  { %v35_v0 = vld [vmem:[%s1061_s1] sm:$0xff]  ;;  %716 = vset.pattern.permute.xlu0 %v794_v1  ;;  %715 = vset.pattern.permute.xlu1 %v795_v2  ;;  %v38_v3 = vld [vmem:[%s1061_s1 + $0x18] sm:$0xff]  ;;  %v36_v4 = vld [vmem:[%s1061_s1 + $0x8] sm:$0xff] }
   0x2   :  { %240 = vperm.xlu0 %716, %v35_v0   ;;  %156 = vperm.xlu1 %715, %v35_v0  }
   0x3   :  { %15 = vsyncpa [#allocation5], 0  ;;  %v37_v5 = vld [vmem:[%s1061_s1 + $0x10] sm:$0xff]  ;;  %v796_v6 = vmov 3   ;;  %v797_v7 = vmov 0   ;;  %v39_v8 = vld [vmem:[%s1062_s2] sm:$0xff]  ;;  %v1069_v12 = vlaneseq }
   0x4   :  { %v42_v9 = vld [vmem:[%s1062_s2 + $0x18] sm:$0xff]  ;;  %v40_v10 = vld [vmem:[%s1062_s2 + $0x8] sm:$0xff]  ;;  %v41_v11 = vld [vmem:[%s1062_s2 + $0x10] sm:$0xff]  ;;  %vm32_vm0 = vcmask 254976   ;;  %vm800_vm1 = vmmov 0   ;;  %vm474_vm2 = vcmask 130112  }
   0x5   :  { %v874_v13 = vshrl.u32 %v1069_v12, 7  ;;  %v43_v16 = vld [vmem:[%s1060_s0] sm:$0xff]  ;;  %v44_v17 = vld [vmem:[%s1060_s0 + $0x8] sm:$0xff]  ;;  %vm481_vm3 = vcmask 195712   ;;  %vm488_vm4 = vcmask 261312   ;;  %vm509_vm5 = vcmask 1041409  }
   0x6   :  { %252 = vperm.xlu0 %716, %v38_v3   ;;  %160 = vperm.xlu1 %715, %v36_v4   ;;  %vm564_vm6 = vcmask 261120   ;;  %s801_s11 = smov [#allocation4]   ;;  %s802_s13 = smov [#allocation2]  }
   0x7   :  { %v121_v14 = vsub.s32 1, %v874_v13  ;;  %v125_v15 = vsub.s32 5, %v874_v13  ;;  %v205_v19 = vsub.s32 2, %v874_v13  ;;  %v209_v20 = vsub.s32 6, %v874_v13  ;;  %s655_s12 = sshll.u32 %s801_s11, 4  ;;  %s645_s14 = sshll.u32 %s802_s13, 4  ;;  %s656_s12 = int_to_ptr.vmem [resolvable:$true] %s655_s12  ;;  %s646_s14 = int_to_ptr.vmem [resolvable:$true] %s645_s14 }
   0x8   :  { %v289_v22 = vsub.s32 3, %v874_v13  ;;  %v293_v23 = vsub.s32 7, %v874_v13  ;;  %v49_v24 = vsub.s32 0, %v874_v13  ;;  %v53_v25 = vsub.s32 4, %v874_v13  ;;  %s724_s1 = scalar_lea.vmem %s656_s12, 32  ;;  %p729_p1 = scmp.lt.s32.totalorder %s656_s12, %s656_s12 }
   0x9   :  { %v122_v26 = vrot.slane %v43_v16, %v121_v14  ;;  %v126_v27 = vrot.slane %v43_v16, %v125_v15  ;;  %v130_v28 = vrot.slane %v44_v17, %v121_v14  ;;  %v134_v29 = vrot.slane %v44_v17, %v125_v15  ;;  %p725_p0 = scmp.ne.s32.totalorder %s656_s12, %s724_s1  ;;  %p730_p2 = scmp.lt.s32.totalorder %s724_s1, %s724_s1 }
   0xa   :  { %719 = vset.pattern.permute.xlu0 %v796_v6  ;;  %164 = vperm.xlu1 %715, %v37_v5   ;;  %v206_v30 = vrot.slane %v43_v16, %v205_v19  ;;  %v210_v31 = vrot.slane %v43_v16, %v209_v20  ;;  %v214_v32 = vrot.slane %v44_v17, %v205_v19 }
   0xb   :  { %328 = vperm.xlu0 %719, %v36_v4   ;;  %v218_v35 = vrot.slane %v44_v17, %v209_v20  ;;  %v290_v36 = vrot.slane %v43_v16, %v289_v22  ;;  %v294_v37 = vrot.slane %v43_v16, %v293_v23  ;;  %v298_v38 = vrot.slane %v44_v17, %v289_v22  ;;  %p731_p3 = por %p730_p2, %p729_p1 }
   0xc   :  { %v302_v39 = vrot.slane %v44_v17, %v293_v23  ;;  %v50_v40 = vrot.slane %v43_v16, %v49_v24  ;;  %v54_v41 = vrot.slane %v43_v16, %v53_v25  ;;  %v58_v42 = vrot.slane %v44_v17, %v49_v24 }
   0xd   :  { %v142_v43 = vrot.slane %v122_v26, %v121_v14  ;;  %v146_v44 = vrot.slane %v126_v27, %v121_v14  ;;  %v150_v45 = vrot.slane %v130_v28, %v121_v14  ;;  %v62_v46 = vrot.slane %v44_v17, %v53_v25  ;;  %p732_p4 = pnand %p731_p3, %p725_p0 }
   0xe   :  { %168 = vperm.xlu1 %715, %v38_v3   ;;  %v154_v47 = vrot.slane %v134_v29, %v121_v14  ;;  %v890_v48 = vrot.slane %v206_v30, %v205_v19  ;;  %v892_v49 = vrot.slane %v210_v31, %v205_v19  ;;  %v894_v50 = vrot.slane %v214_v32, %v205_v19 }
   0xf   :  { %720 = vset.pattern.permute.xlu0 %v797_v7  ;;  %v896_v52 = vrot.slane %v218_v35, %v205_v19  ;;  %v898_v53 = vrot.slane %v290_v36, %v289_v22  ;;  %v900_v54 = vrot.slane %v294_v37, %v289_v22  ;;  %v902_v55 = vrot.slane %v298_v38, %v289_v22 }
  0x10   :  { %85 = vperm.xlu0 %720, %v35_v0   ;;  %v904_v57 = vrot.slane %v302_v39, %v289_v22  ;;  %v906_v58 = vrot.slane %v50_v40, %v49_v24  ;;  %v908_v59 = vrot.slane %v54_v41, %v49_v24  ;;  %v910_v60 = vrot.slane %v58_v42, %v49_v24 }
  0x12   :  { %717 = vset.pattern.permute.xlu1 %v794_v1 }
  0x13   :  { %244 = vperm.xlu1 %717, %v36_v4  }
  0x14   :  { %90 = vperm.xlu0 %720, %v36_v4  }
  0x17   :  { %248 = vperm.xlu1 %717, %v37_v5  }
  0x18   :  { %95 = vperm.xlu0 %720, %v37_v5  }
  0x1b   :  { %718 = vset.pattern.permute.xlu1 %v796_v6 }
  0x1c   :  { %100 = vperm.xlu0 %720, %v38_v3   ;;  %324 = vperm.xlu1 %718, %v35_v0   ;;  %v912_v0 = vrot.slane %v62_v46, %v49_v24 }
  0x20   :  { %373 = vperm.xlu0 %720, %v39_v8   ;;  %332 = vperm.xlu1 %718, %v37_v5  }
  0x24   :  { %388 = vperm.xlu0 %720, %v42_v9   ;;  %336 = vperm.xlu1 %718, %v38_v3  }
  0x28   :  { %721 = vset.pattern.permute.xlu1 %v797_v7 }
  0x29   :  { %378 = vperm.xlu1 %721, %v40_v10  }
  0x2d   :  { %383 = vperm.xlu1 %721, %v41_v11  }
  0x81   :  { %v157_v18 = vpop.permute.xlu1 %156  ;;  %v241_v21 = vpop.permute.xlu0 %240 }
  0x82   :  { %v171_v61 = vmul.f32 %v157_v18, %v142_v43  ;;  %v172_v62 = vmul.f32 %v157_v18, %v146_v44  ;;  %v179_v63 = vmul.f32 %v157_v18, %v150_v45  ;;  %v180_v1 = vmul.f32 %v157_v18, %v154_v47 }
  0x83   :  { %v255_v2 = vmul.f32 %v241_v21, %v890_v48  ;;  %v256_v3 = vmul.f32 %v241_v21, %v892_v49  ;;  %v263_v4 = vmul.f32 %v241_v21, %v894_v50  ;;  %v264_v6 = vmul.f32 %v241_v21, %v896_v52 }
  0x85   :  { %v161_v33 = vpop.permute.xlu1 %160  ;;  %v253_v34 = vpop.permute.xlu0 %252 }
  0x86   :  { %v173_v7 = vmul.f32 %v161_v33, %v142_v43  ;;  %v174_v8 = vmul.f32 %v161_v33, %v146_v44  ;;  %v181_v9 = vmul.f32 %v161_v33, %v150_v45  ;;  %v182_v10 = vmul.f32 %v161_v33, %v154_v47 }
  0x87   :  { %v919_v11 = vmul.f32 %v253_v34, %v890_v48  ;;  %v922_v14 = vmul.f32 %v253_v34, %v892_v49  ;;  %v925_v15 = vmul.f32 %v253_v34, %v894_v50  ;;  %v928_v17 = vmul.f32 %v253_v34, %v896_v52 }
  0x89   :  { %v165_v51 = vpop.permute.xlu1 %164 }
  0x8a   :  { %v329_v56 = vpop.permute.xlu0 %328  ;;  %v175_v18 = vmul.f32 %v165_v51, %v142_v43  ;;  %v176_v21 = vmul.f32 %v165_v51, %v146_v44  ;;  %v183_v22 = vmul.f32 %v165_v51, %v150_v45  ;;  %v184_v25 = vmul.f32 %v165_v51, %v154_v47 }
  0x8b   :  { %v935_v26 = vmul.f32 %v329_v56, %v898_v53  ;;  %v938_v27 = vmul.f32 %v329_v56, %v900_v54  ;;  %v941_v28 = vmul.f32 %v329_v56, %v902_v55  ;;  %v350_v30 = vmul.f32 %v329_v56, %v904_v57 }
  0x8d   :  { %v169_v5 = vpop.permute.xlu1 %168 }
  0x8e   :  { %v944_v31 = vmul.f32 %v169_v5, %v142_v43  ;;  %v950_v39 = vmul.f32 %v169_v5, %v146_v44  ;;  %v185_v40 = vmul.f32 %v169_v5, %v150_v45  ;;  %v186_v46 = vmul.f32 %v169_v5, %v154_v47 }
  0x8f   :  { %v86_v16 = vpop.permute.xlu0 %85 }
  0x90   :  { %v103_v19 = vmul.f32 %v86_v16, %v906_v58  ;;  %v104_v20 = vmul.f32 %v86_v16, %v908_v59  ;;  %v111_v23 = vmul.f32 %v86_v16, %v910_v60  ;;  %v112_v24 = vmul.f32 %v86_v16, %v912_v0 }
  0x92   :  { %v245_v29 = vpop.permute.xlu1 %244  ;;  %v187_v32 = vadd.f32 %v171_v61, %v103_v19  ;;  %v188_v33 = vadd.f32 %v172_v62, %v104_v20  ;;  %v195_v41 = vadd.f32 %v179_v63, %v111_v23  ;;  %v196_v42 = vadd.f32 %v180_v1, %v112_v24 }
  0x93   :  { %v91_v34 = vpop.permute.xlu0 %90  ;;  %v257_v43 = vmul.f32 %v245_v29, %v890_v48  ;;  %v258_v51 = vmul.f32 %v245_v29, %v892_v49  ;;  %v265_v56 = vmul.f32 %v245_v29, %v894_v50  ;;  %v266_v62 = vmul.f32 %v245_v29, %v896_v52 }
  0x94   :  { %v105_v35 = vmul.f32 %v91_v34, %v906_v58  ;;  %v106_v36 = vmul.f32 %v91_v34, %v908_v59  ;;  %v113_v37 = vmul.f32 %v91_v34, %v910_v60  ;;  %v114_v38 = vmul.f32 %v91_v34, %v912_v0 }
  0x95   :  { %v271_v45 = vadd.f32 %v255_v2, %v187_v32  ;;  %v272_v63 = vadd.f32 %v256_v3, %v188_v33  ;;  %v279_v5 = vadd.f32 %v263_v4, %v195_v41  ;;  %v280_v23 = vadd.f32 %v264_v6, %v196_v42 }
  0x96   :  { %v249_v61 = vpop.permute.xlu1 %248  ;;  %v189_v16 = vadd.f32 %v173_v7, %v105_v35  ;;  %v197_v19 = vadd.f32 %v181_v9, %v113_v37  ;;  %v198_v20 = vadd.f32 %v182_v10, %v114_v38  ;;  %v190_v34 = vadd.f32 %v174_v8, %v106_v36 }
  0x97   :  { %v96_v12 = vpop.permute.xlu0 %95  ;;  %v958_v47 = vmul.f32 %v249_v61, %v890_v48  ;;  %v961_v1 = vmul.f32 %v249_v61, %v892_v49  ;;  %v267_v24 = vmul.f32 %v249_v61, %v894_v50  ;;  %v268_v10 = vmul.f32 %v249_v61, %v896_v52 }
  0x98   :  { %v107_v44 = vmul.f32 %v96_v12, %v906_v58  ;;  %v108_v7 = vmul.f32 %v96_v12, %v908_v59  ;;  %v115_v9 = vmul.f32 %v96_v12, %v910_v60  ;;  %v116_v8 = vmul.f32 %v96_v12, %v912_v0 }
  0x99   :  { %v281_v29 = vadd.f32 %v265_v56, %v197_v19  ;;  %v282_v48 = vadd.f32 %v266_v62, %v198_v20  ;;  %v273_v32 = vadd.f32 %v257_v43, %v189_v16  ;;  %v274_v6 = vadd.f32 %v258_v51, %v190_v34 }
  0x9a   :  { %v191_v33 = vadd.f32 %v175_v18, %v107_v44  ;;  %v192_v52 = vadd.f32 %v176_v21, %v108_v7  ;;  %v199_v37 = vadd.f32 %v183_v22, %v115_v9  ;;  %v200_v38 = vadd.f32 %v184_v25, %v116_v8 }
  0x9b   :  { %v101_v2 = vpop.permute.xlu0 %100  ;;  %v325_v3 = vpop.permute.xlu1 %324  ;;  %v365_v62 = vadd.f32 %v941_v28, %v281_v29  ;;  %v366_v16 = vadd.f32 %v350_v30, %v282_v48  ;;  %v357_v21 = vadd.f32 %v935_v26, %v273_v32  ;;  %v358_v44 = vadd.f32 %v938_v27, %v274_v6 }
  0x9c   :  { %v117_v49 = vmul.f32 %v101_v2, %v910_v60  ;;  %v118_v4 = vmul.f32 %v101_v2, %v912_v0  ;;  %v339_v50 = vmul.f32 %v325_v3, %v898_v53  ;;  %v340_v35 = vmul.f32 %v325_v3, %v900_v54 }
  0x9d   :  { %v347_v36 = vmul.f32 %v325_v3, %v902_v55  ;;  %v348_v12 = vmul.f32 %v325_v3, %v904_v57  ;;  %v109_v41 = vmul.f32 %v101_v2, %v906_v58  ;;  %v110_v19 = vmul.f32 %v101_v2, %v908_v59 }
  0x9e   :  { %v355_v43 = vadd.f32 %v339_v50, %v271_v45  ;;  %v356_v60 = vadd.f32 %v340_v35, %v272_v63  ;;  %v201_v51 = vadd.f32 %v185_v40, %v117_v49  ;;  %v202_v61 = vadd.f32 %v186_v46, %v118_v4 }
  0x9f   :  { %v374_v42 = vpop.permute.xlu0 %373  ;;  %v333_v18 = vpop.permute.xlu1 %332  ;;  %v363_v56 = vadd.f32 %v347_v36, %v279_v5  ;;  %v364_v0 = vadd.f32 %v348_v12, %v280_v23  ;;  %v193_v22 = vadd.f32 %v944_v31, %v109_v41  ;;  %v194_v31 = vadd.f32 %v950_v39, %v110_v19 }
  0xa0   :  { %v391_v20 = vadd.f32 %v374_v42, %v355_v43  ;;  %v392_v34 = vadd.f32 %v374_v42, %v356_v60  ;;  %v351_v58 = vmul.f32 %v333_v18, %v902_v55  ;;  %v352_v25 = vmul.f32 %v333_v18, %v904_v57 }
  0xa1   :  { %v399_v63 = vadd.f32 %v374_v42, %v363_v56  ;;  %v400_v28 = vadd.f32 %v374_v42, %v364_v0  ;;  %v285_v5 = vadd.f32 %v925_v15, %v201_v51  ;;  %v286_v26 = vadd.f32 %v928_v17, %v202_v61 }
  0xa2   :  { %v407_v40 = vmax.f32 %v391_v20, 0.0  ;;  %v408_v46 = vmax.f32 %v392_v34, 0.0  ;;  %v343_v23 = vmul.f32 %v333_v18, %v898_v53  ;;  %v344_v7 = vmul.f32 %v333_v18, %v900_v54 }
  0xa3   :  { %v337_v45 = vpop.permute.xlu1 %336  ;;  %v283_v9 = vadd.f32 %v267_v24, %v199_v37  ;;  %v284_v8 = vadd.f32 %v268_v10, %v200_v38  ;;  %v416_v15 = vmax.f32 %v400_v28, 0.0  ;;  %v275_v39 = vadd.f32 %v958_v47, %v191_v33  ;;  %v389_v4 = vpop.permute.xlu0 %388  ;;  %v562_v28 = vld [vmem:[%s1065_s5 + $0x10] sm:$0xff] }
  0xa4   :  { %v353_v30 = vmul.f32 %v337_v45, %v902_v55  ;;  %v354_v59 = vmul.f32 %v337_v45, %v904_v57  ;;  %v423_v27 = vadd.f32 %v408_v46, %v407_v40  ;;  %v345_v29 = vmul.f32 %v337_v45, %v898_v53  ;;  %v560_v46 = vld [vmem:[%s1065_s5] sm:$0xff] }
  0xa5   :  { %v346_v55 = vmul.f32 %v337_v45, %v900_v54  ;;  %v415_v57 = vmax.f32 %v399_v63, 0.0  ;;  %v367_v17 = vadd.f32 %v351_v58, %v283_v9  ;;  %v368_v32 = vadd.f32 %v352_v25, %v284_v8  ;;  %v561_v63 = vld [vmem:[%s1065_s5 + $0x8] sm:$0xff] }
  0xa6   :  { %v369_v2 = vadd.f32 %v353_v30, %v285_v5  ;;  %v370_v3 = vadd.f32 %v354_v59, %v286_v26  ;;  %424 = vadd.xlane.f32.xlu1 %v423_v27  ;;  %v276_v49 = vadd.f32 %v961_v1, %v192_v52  ;;  %v277_v53 = vadd.f32 %v919_v11, %v193_v22  ;;  %v563_v5 = vld [vmem:[%s1065_s5 + $0x18] sm:$0xff] }
  0xa7   :  { %v278_v54 = vadd.f32 %v922_v14, %v194_v31  ;;  %v359_v18 = vadd.f32 %v343_v23, %v275_v39  ;;  %v435_v14 = vadd.f32 %v416_v15, %v415_v57  ;;  %v798_v30 = vmov 0.0|0.0  }
  0xa8   :  { %v379_v48 = vpop.permute.xlu1 %378  ;;  %v405_v35 = vadd.f32 %v389_v4, %v369_v2  ;;  %v406_v36 = vadd.f32 %v389_v4, %v370_v3  ;;  %v360_v47 = vadd.f32 %v344_v7, %v276_v49  ;;  %v361_v33 = vadd.f32 %v345_v29, %v277_v53  ;;  %699 = vmatprep.subr.bf16.mxu0 %v798_v30 }
  0xa9   :  { %v401_v6 = vadd.f32 %v379_v48, %v365_v62  ;;  %v402_v24 = vadd.f32 %v379_v48, %v366_v16  ;;  %v393_v10 = vadd.f32 %v379_v48, %v357_v21  ;;  %v394_v50 = vadd.f32 %v379_v48, %v358_v44 }
  0xaa   :  { %v362_v1 = vadd.f32 %v346_v55, %v278_v54  ;;  %v421_v62 = vmax.f32 %v405_v35, 0.0  ;;  %v422_v16 = vmax.f32 %v406_v36, 0.0  ;;  %v397_v19 = vadd.f32 %v389_v4, %v361_v33 }
  0xab   :  { %v417_v12 = vmax.f32 %v401_v6, 0.0  ;;  %v418_v37 = vmax.f32 %v402_v24, 0.0  ;;  %v409_v38 = vmax.f32 %v393_v10, 0.0  ;;  %v410_v41 = vmax.f32 %v394_v50, 0.0 }
  0xac   :  { %v384_v42 = vpop.permute.xlu1 %383  ;;  %v398_v22 = vadd.f32 %v389_v4, %v362_v1  ;;  %v444_v58 = vadd.f32 %v422_v16, %v421_v62  ;;  %v413_v44 = vmax.f32 %v397_v19, 0.0  ;;  %v700_v59 = vpack.c.bf16 %v561_v63, %v560_v46  ;;  %v680_v46 = vld [vmem:[%s1063_s3] ss:$0 sm:$0xff] }
  0xad   :  { %v438_v52 = vadd.f32 %v418_v37, %v417_v12  ;;  %v426_v43 = vadd.f32 %v410_v41, %v409_v38  ;;  %v403_v60 = vadd.f32 %v384_v42, %v367_v17  ;;  %v404_v56 = vadd.f32 %v384_v42, %v368_v32 }
  0xae   :  { %v395_v0 = vadd.f32 %v384_v42, %v359_v18  ;;  %v396_v51 = vadd.f32 %v384_v42, %v360_v47  ;;  %v414_v45 = vmax.f32 %v398_v22, 0.0  ;;  %v799_v26 = vmov 0.0   ;;  %701 = vmatpush3.bf16.msra.mxu0 %v700_v59 }
  0xaf   :  { %439 = vadd.xlane.f32.xlu1 %v438_v52  ;;  %427 = vadd.xlane.f32.xlu0 %v426_v43  ;;  %v419_v11 = vmax.f32 %v403_v60, 0.0  ;;  %v420_v61 = vmax.f32 %v404_v56, 0.0  ;;  %33 = vst.msk [vmem:[#allocation2] sm:$0x3] %vm32_vm0, %v799_v26  ;;  %v703_v31 = vpack.c.bf16 %v563_v5, %v562_v28  ;;  %v1070_v7 = vlaneseq  ;;  %v681_v28 = vld [vmem:[%s1064_s4] ss:$0 sm:$0xff] }
  0xb0   :  { %v411_v34 = vmax.f32 %v395_v0, 0.0  ;;  %v412_v21 = vmax.f32 %v396_v51, 0.0  ;;  %v432_v40 = vadd.f32 %v414_v45, %v413_v44  ;;  %702 = vmatprep.subr.bf16.mxu0 %v798_v30  ;;  %696 = vmatprep.mubr.msk.f32.mxu0 %vm800_vm1, %v799_v26 }
  0xb1   :  { %v441_v20 = vadd.f32 %v420_v61, %v419_v11  ;;  %v464_v27 = vand.u32 127, %v1070_v7 }
  0xb2   :  { %v429_v25 = vadd.f32 %v412_v21, %v411_v34  ;;  %704 = vmatpush3.bf16.msra.mxu0 %v703_v31 }
  0xb3   :  { %436 = vadd.xlane.f32.xlu0 %v435_v14  ;;  %442 = vadd.xlane.f32.xlu1 %v441_v20  ;;  %v469_v2 = vadd.s32 4294967288, %v464_v27  ;;  %v476_v3 = vadd.s32 4294967280, %v464_v27  ;;  %v483_v29 = vadd.s32 4294967272, %v464_v27  ;;  %v467_v15 = vsub.s32 %v464_v27, %v874_v13 }
  0xb5   :  { %v472_v48 = vsub.s32 %v469_v2, %v874_v13  ;;  %v479_v17 = vsub.s32 %v476_v3, %v874_v13  ;;  %v486_v39 = vsub.s32 %v483_v29, %v874_v13 }
  0xb6   :  { %v34_v42 = vld [vmem:[#allocation2] sm:$0x3] }
  0xb7   :  { %445 = vadd.xlane.f32.xlu1 %v444_v58  ;;  %430 = vadd.xlane.f32.xlu0 %v429_v25 }
  0xbb   :  { %433 = vadd.xlane.f32.xlu0 %v432_v40 }
 0x133   :  { %v425_v23 = vpop.xlane.xlu1 %424 }
 0x134   :  { %v468_v35 = vrot.slane %v425_v23, %v467_v15 }
 0x13c   :  { %v428_v9 = vpop.xlane.xlu0 %427  ;;  %v440_v8 = vpop.xlane.xlu1 %439 }
 0x13d   :  { %v473_v6 = vrot.slane %v428_v9, %v472_v48  ;;  %v497_v24 = vrot.slane %v440_v8, %v472_v48 }
 0x13f   :  { %v475_v12 = vsel %vm474_vm2, %v473_v6, %v468_v35 }
 0x140   :  { %v437_v55 = vpop.xlane.xlu0 %436  ;;  %v443_v57 = vpop.xlane.xlu1 %442 }
 0x141   :  { %v493_v32 = vrot.slane %v437_v55, %v467_v15  ;;  %v502_v10 = vrot.slane %v443_v57, %v479_v17 }
 0x143   :  { %v498_v36 = vsel %vm474_vm2, %v497_v24, %v493_v32 }
 0x144   :  { %v431_v49 = vpop.xlane.xlu0 %430  ;;  %v446_v4 = vpop.xlane.xlu1 %445  ;;  %v503_v38 = vsel %vm481_vm3, %v502_v10, %v498_v36 }
 0x145   :  { %v480_v50 = vrot.slane %v431_v49, %v479_v17  ;;  %v507_v53 = vrot.slane %v446_v4, %v486_v39 }
 0x147   :  { %v482_v41 = vsel %vm481_vm3, %v480_v50, %v475_v12  ;;  %v508_v13 = vsel %vm488_vm4, %v507_v53, %v503_v38 }
 0x148   :  { %v434_v54 = vpop.xlane.xlu0 %433 }
 0x149   :  { %v487_v37 = vrot.slane %v434_v54, %v486_v39 }
 0x14b   :  { %v489_v18 = vsel %vm488_vm4, %v487_v37, %v482_v41 }
 0x14c   :  { %v510_v47 = vsel %vm509_vm5, %v508_v13, %v489_v18 }
 0x14d   :  { %v512_v33 = vadd.f32 %v510_v47, %v34_v42 }
 0x14f   :  { %514 = vst.msk [vmem:[#allocation2] sm:$0x3] %vm32_vm0, %v512_v33 }
 0x156   :  { %v518_v1 = vld [vmem:[#allocation2] sm:$0x3] }
 0x157   :  { %v519_v52 = vmul.f32 0.00390625, %v518_v1 }
 0x159   :  { %v521_v43 = vsel %vm32_vm0, %v519_v52, 0.0  ;;  %520 = vst.msk [vmem:[#allocation2] sm:$0x3] %vm32_vm0, %v519_v52 }
 0x15a   :  { %v522_v60 = vrot.slane %v521_v43, 4 }
 0x15c   :  { %v523_v56 = vadd.f32 %v522_v60, %v521_v43 }
 0x15e   :  { %v524_v0 = vrot.slane %v523_v56, 2 }
 0x160   :  { %v525_v51 = vadd.f32 %v524_v0, %v523_v56 }
 0x162   :  { %v526_v11 = vrot.slane %v525_v51, 1 }
 0x164   :  { %v527_v61 = vadd.f32 %v526_v11, %v525_v51 }
 0x166   :  { %v529_v14 = vmul.f32 0.5, %v527_v61 }
 0x168   :  { %v530_v62 = vsub.f32 %v519_v52, %v529_v14 }
 0x16a   :  { %v531_v16 = vmul.f32 %v530_v62, %v530_v62 }
 0x16c   :  { %v532_v19 = vsel %vm32_vm0, %v531_v16, 0.0 }
 0x16d   :  { %v533_v20 = vrot.slane %v532_v19, 4 }
 0x16f   :  { %v534_v34 = vadd.f32 %v533_v20, %v532_v19 }
 0x171   :  { %v535_v21 = vrot.slane %v534_v34, 2 }
 0x173   :  { %v536_v22 = vadd.f32 %v535_v21, %v534_v34 }
 0x175   :  { %v537_v58 = vrot.slane %v536_v22, 1 }
 0x177   :  { %v538_v25 = vadd.f32 %v537_v58, %v536_v22 }
 0x179   :  { %v539_v44 = vmul.f32 0.5, %v538_v25 }
 0x17b   :  { %v540_v45 = vadd.f32 1e-05, %v539_v44 }
 0x17d   :  { %722 = vrsqrt.f32 %v540_v45 }
 0x187   :  { %v723_v40 = vpop.eup %722 }
 0x188   :  { %v542_v63 = vmul.f32 %v723_v40, %v530_v62 }
 0x18a   :  { %v550_v30 = vmul.f32 %v680_v46, %v542_v63 }
 0x18c   :  { %v558_v59 = vadd.f32 %v681_v28, %v550_v30 }
 0x18e   :  { %697 = vmatmul.mubr.msk.f32.vlgmr.msra.gmra.mrb[0].mxu0 %vm564_vm6, %v558_v59  ;;  %559 = vst.msk [vmem:[#allocation4] sm:$0x3] %vm32_vm0, %v558_v59 }
 0x18f   :  { %735 = shalt.err (!%p732_p4)
}
 0x190   :  { %s736_s15 = scalar_lea.hbm %s1067_s7, 32 }
 0x191   :  { %p737_p5 = scmp.ne.s32.totalorder %s1067_s7, %s736_s15  ;;  %p740_p6 = scmp.lt.u32.totalorder %s736_s15, %s1067_s7 }
 0x193   :  { %p742_p7 = pnand %p740_p6, %p737_p5 }
 0x195   :  { %745 = shalt.err (!%p742_p7)
}
 0x196   :  { %658 = dma.vmem_to_hbm [thread:$0]  %s656_s12, 32, %s1067_s7, [#allocation5]  }
 0x197   :  { %s746_s22 = scalar_lea.vmem %s646_s14, 32  ;;  %p751_p9 = scmp.lt.s32.totalorder %s646_s14, %s646_s14 }
 0x198   :  { %p747_p8 = scmp.ne.s32.totalorder %s646_s14, %s746_s22  ;;  %p752_p10 = scmp.lt.s32.totalorder %s746_s22, %s746_s22 }
 0x19a   :  { %p753_p11 = por %p752_p10, %p751_p9 }
 0x19c   :  { %p754_p12 = pnand %p753_p11, %p747_p8 }
 0x19e   :  { %757 = shalt.err (!%p754_p12)
}
 0x19f   :  { %s758_s2 = scalar_lea.hbm %s1066_s6, 32 }
 0x1a0   :  { %p759_p13 = scmp.ne.s32.totalorder %s1066_s6, %s758_s2  ;;  %p762_p0 = scmp.lt.u32.totalorder %s758_s2, %s1066_s6 }
 0x1a2   :  { %p764_p1 = pnand %p762_p0, %p759_p13 }
 0x1a4   :  { %767 = shalt.err (!%p764_p1)
}
 0x1a5   :  { %648 = dma.vmem_to_hbm [thread:$0]  %s646_s14, 32, %s1066_s6, [#allocation3]  }
 0x1a6   :  { %s803_s29 = smov [#allocation6]  }
 0x1a7   :  { %s665_s5 = sshll.u32 %s803_s29, 4  ;;  %s666_s5 = int_to_ptr.vmem [resolvable:$true] %s665_s5 }
 0x1a8   :  { %s768_s30 = scalar_lea.vmem %s666_s5, 32  ;;  %p773_p3 = scmp.lt.s32.totalorder %s666_s5, %s666_s5 }
 0x1a9   :  { %p769_p2 = scmp.ne.s32.totalorder %s666_s5, %s768_s30  ;;  %p774_p4 = scmp.lt.s32.totalorder %s768_s30, %s768_s30 }
 0x1ab   :  { %p775_p5 = por %p774_p4, %p773_p3 }
 0x1ad   :  { %p776_p6 = pnand %p775_p5, %p769_p2 }
 0x261   :  { %v634_v5 = vpop.f32.mrb[0].mxu0 }
 0x262   :  { %638 = vst [vmem:[#allocation6] sm:$0x3] %v634_v5  ;;  %v698_v26 = vpop.f32.mrb[1].mxu0 }
 0x263   :  { %779 = shalt.err (!%p776_p6)
}
 0x264   :  { %s780_s11 = scalar_lea.hbm %s1068_s8, 32 }
 0x265   :  { %p781_p7 = scmp.ne.s32.totalorder %s1068_s8, %s780_s11  ;;  %p784_p8 = scmp.lt.u32.totalorder %s780_s11, %s1068_s8 }
 0x267   :  { %p786_p9 = pnand %p784_p8, %p781_p7 }
 0x269   :  { %789 = shalt.err (!%p786_p9)
}
 0x26a   :  { %668 = dma.vmem_to_hbm [thread:$0]  %s666_s5, 32, %s1068_s8, [#allocation5]  }
 0x26b   :  { %790 = dma.done.wait [#allocation3], 32  }
 0x26c   :  { %791 = vsyncadd [#allocation3], 4294967264 }
 0x26d   :  { %792 = dma.done.wait [#allocation5], 64  }
 0x26e   :  { %793 = vsyncadd [#allocation5], 4294967232 }
 0x26f   :  { %678 = vsyncpa [#allocation3], 1 }
 0x270   :  { %679 = vsyncpa [#allocation5], 1 }

// kernel: tpu_custom_call.1
= control target key start
LH: loop header
LB: loop body
LE: loop exit
PB: predicated region body
PF: predicated region fallthrough
CT: control target
= control target key end

     0   :  { %14 = vsyncpa [#allocation3], 0  ;;  %v794_v1 = vmov 2   ;;  %v795_v2 = vmov 1   ;;  %s1060_s0 = inlined_call_operand.vmem [shape: f32[2,4,256], index: 0, kind: input, shape index: {}]   ;;  %s1061_s1 = inlined_call_operand.vmem [shape: f32[32,4], index: 1, kind: input, shape index: {}]   ;;  %s1062_s2 = inlined_call_operand.vmem [shape: f32[32,1], index: 2, kind: input, shape index: {}]   ;;  %s1063_s3 = inlined_call_operand.vmem [shape: f32[1,32], index: 3, kind: input, shape index: {}]   ;;  %s1064_s4 = inlined_call_operand.vmem [shape: f32[1,32], index: 4, kind: input, shape index: {}]   ;;  %s1065_s5 = inlined_call_operand.vmem [shape: f32[32,128], index: 5, kind: input, shape index: {}]   ;;  %s1066_s6 = inlined_call_operand.hbm [shape: f32[2,32], index: 6, kind: output, shape index: {0}]   ;;  %s1067_s7 = inlined_call_operand.hbm [shape: f32[2,32], index: 7, kind: output, shape index: {1}]   ;;  %s1068_s8 = inlined_call_operand.hbm [shape: f32[2,128], index: 8, kind: output, shape index: {2}]  }
   0x1   :  { %v35_v0 = vld [vmem:[%s1061_s1] sm:$0xff]  ;;  %716 = vset.pattern.permute.xlu0 %v794_v1  ;;  %715 = vset.pattern.permute.xlu1 %v795_v2  ;;  %v38_v3 = vld [vmem:[%s1061_s1 + $0x18] sm:$0xff]  ;;  %v36_v4 = vld [vmem:[%s1061_s1 + $0x8] sm:$0xff] }
   0x2   :  { %240 = vperm.xlu0 %716, %v35_v0   ;;  %156 = vperm.xlu1 %715, %v35_v0  }
   0x3   :  { %15 = vsyncpa [#allocation5], 0  ;;  %v37_v5 = vld [vmem:[%s1061_s1 + $0x10] sm:$0xff]  ;;  %v796_v6 = vmov 3   ;;  %v797_v7 = vmov 0   ;;  %v39_v8 = vld [vmem:[%s1062_s2] sm:$0xff]  ;;  %v1069_v12 = vlaneseq }
   0x4   :  { %v42_v9 = vld [vmem:[%s1062_s2 + $0x18] sm:$0xff]  ;;  %v40_v10 = vld [vmem:[%s1062_s2 + $0x8] sm:$0xff]  ;;  %v41_v11 = vld [vmem:[%s1062_s2 + $0x10] sm:$0xff]  ;;  %vm32_vm0 = vcmask 254976   ;;  %vm800_vm1 = vmmov 0   ;;  %vm474_vm2 = vcmask 130112  }
   0x5   :  { %v874_v13 = vshrl.u32 %v1069_v12, 7  ;;  %v43_v16 = vld [vmem:[%s1060_s0] sm:$0xff]  ;;  %v44_v17 = vld [vmem:[%s1060_s0 + $0x8] sm:$0xff]  ;;  %vm481_vm3 = vcmask 195712   ;;  %vm488_vm4 = vcmask 261312   ;;  %vm509_vm5 = vcmask 1041409  }
   0x6   :  { %252 = vperm.xlu0 %716, %v38_v3   ;;  %160 = vperm.xlu1 %715, %v36_v4   ;;  %vm564_vm6 = vcmask 261120   ;;  %s801_s11 = smov [#allocation4]   ;;  %s802_s13 = smov [#allocation2]  }
   0x7   :  { %v121_v14 = vsub.s32 1, %v874_v13  ;;  %v125_v15 = vsub.s32 5, %v874_v13  ;;  %v205_v19 = vsub.s32 2, %v874_v13  ;;  %v209_v20 = vsub.s32 6, %v874_v13  ;;  %s655_s12 = sshll.u32 %s801_s11, 4  ;;  %s645_s14 = sshll.u32 %s802_s13, 4  ;;  %s656_s12 = int_to_ptr.vmem [resolvable:$true] %s655_s12  ;;  %s646_s14 = int_to_ptr.vmem [resolvable:$true] %s645_s14 }
   0x8   :  { %v289_v22 = vsub.s32 3, %v874_v13  ;;  %v293_v23 = vsub.s32 7, %v874_v13  ;;  %v49_v24 = vsub.s32 0, %v874_v13  ;;  %v53_v25 = vsub.s32 4, %v874_v13  ;;  %s724_s1 = scalar_lea.vmem %s656_s12, 32  ;;  %p729_p1 = scmp.lt.s32.totalorder %s656_s12, %s656_s12 }
   0x9   :  { %v122_v26 = vrot.slane %v43_v16, %v121_v14  ;;  %v126_v27 = vrot.slane %v43_v16, %v125_v15  ;;  %v130_v28 = vrot.slane %v44_v17, %v121_v14  ;;  %v134_v29 = vrot.slane %v44_v17, %v125_v15  ;;  %p725_p0 = scmp.ne.s32.totalorder %s656_s12, %s724_s1  ;;  %p730_p2 = scmp.lt.s32.totalorder %s724_s1, %s724_s1 }
   0xa   :  { %719 = vset.pattern.permute.xlu0 %v796_v6  ;;  %164 = vperm.xlu1 %715, %v37_v5   ;;  %v206_v30 = vrot.slane %v43_v16, %v205_v19  ;;  %v210_v31 = vrot.slane %v43_v16, %v209_v20  ;;  %v214_v32 = vrot.slane %v44_v17, %v205_v19 }
   0xb   :  { %328 = vperm.xlu0 %719, %v36_v4   ;;  %v218_v35 = vrot.slane %v44_v17, %v209_v20  ;;  %v290_v36 = vrot.slane %v43_v16, %v289_v22  ;;  %v294_v37 = vrot.slane %v43_v16, %v293_v23  ;;  %v298_v38 = vrot.slane %v44_v17, %v289_v22  ;;  %p731_p3 = por %p730_p2, %p729_p1 }
   0xc   :  { %v302_v39 = vrot.slane %v44_v17, %v293_v23  ;;  %v50_v40 = vrot.slane %v43_v16, %v49_v24  ;;  %v54_v41 = vrot.slane %v43_v16, %v53_v25  ;;  %v58_v42 = vrot.slane %v44_v17, %v49_v24 }
   0xd   :  { %v142_v43 = vrot.slane %v122_v26, %v121_v14  ;;  %v146_v44 = vrot.slane %v126_v27, %v121_v14  ;;  %v150_v45 = vrot.slane %v130_v28, %v121_v14  ;;  %v62_v46 = vrot.slane %v44_v17, %v53_v25  ;;  %p732_p4 = pnand %p731_p3, %p725_p0 }
   0xe   :  { %168 = vperm.xlu1 %715, %v38_v3   ;;  %v154_v47 = vrot.slane %v134_v29, %v121_v14  ;;  %v890_v48 = vrot.slane %v206_v30, %v205_v19  ;;  %v892_v49 = vrot.slane %v210_v31, %v205_v19  ;;  %v894_v50 = vrot.slane %v214_v32, %v205_v19 }
   0xf   :  { %720 = vset.pattern.permute.xlu0 %v797_v7  ;;  %v896_v52 = vrot.slane %v218_v35, %v205_v19  ;;  %v898_v53 = vrot.slane %v290_v36, %v289_v22  ;;  %v900_v54 = vrot.slane %v294_v37, %v289_v22  ;;  %v902_v55 = vrot.slane %v298_v38, %v289_v22 }
  0x10   :  { %85 = vperm.xlu0 %720, %v35_v0   ;;  %v904_v57 = vrot.slane %v302_v39, %v289_v22  ;;  %v906_v58 = vrot.slane %v50_v40, %v49_v24  ;;  %v908_v59 = vrot.slane %v54_v41, %v49_v24  ;;  %v910_v60 = vrot.slane %v58_v42, %v49_v24 }
  0x12   :  { %717 = vset.pattern.permute.xlu1 %v794_v1 }
  0x13   :  { %244 = vperm.xlu1 %717, %v36_v4  }
  0x14   :  { %90 = vperm.xlu0 %720, %v36_v4  }
  0x17   :  { %248 = vperm.xlu1 %717, %v37_v5  }
  0x18   :  { %95 = vperm.xlu0 %720, %v37_v5  }
  0x1b   :  { %718 = vset.pattern.permute.xlu1 %v796_v6 }
  0x1c   :  { %100 = vperm.xlu0 %720, %v38_v3   ;;  %324 = vperm.xlu1 %718, %v35_v0   ;;  %v912_v0 = vrot.slane %v62_v46, %v49_v24 }
  0x20   :  { %373 = vperm.xlu0 %720, %v39_v8   ;;  %332 = vperm.xlu1 %718, %v37_v5  }
  0x24   :  { %388 = vperm.xlu0 %720, %v42_v9   ;;  %336 = vperm.xlu1 %718, %v38_v3  }
  0x28   :  { %721 = vset.pattern.permute.xlu1 %v797_v7 }
  0x29   :  { %378 = vperm.xlu1 %721, %v40_v10  }
  0x2d   :  { %383 = vperm.xlu1 %721, %v41_v11  }
  0x81   :  { %v157_v18 = vpop.permute.xlu1 %156  ;;  %v241_v21 = vpop.permute.xlu0 %240 }
  0x82   :  { %v171_v61 = vmul.f32 %v157_v18, %v142_v43  ;;  %v172_v62 = vmul.f32 %v157_v18, %v146_v44  ;;  %v179_v63 = vmul.f32 %v157_v18, %v150_v45  ;;  %v180_v1 = vmul.f32 %v157_v18, %v154_v47 }
  0x83   :  { %v255_v2 = vmul.f32 %v241_v21, %v890_v48  ;;  %v256_v3 = vmul.f32 %v241_v21, %v892_v49  ;;  %v263_v4 = vmul.f32 %v241_v21, %v894_v50  ;;  %v264_v6 = vmul.f32 %v241_v21, %v896_v52 }
  0x85   :  { %v161_v33 = vpop.permute.xlu1 %160  ;;  %v253_v34 = vpop.permute.xlu0 %252 }
  0x86   :  { %v173_v7 = vmul.f32 %v161_v33, %v142_v43  ;;  %v174_v8 = vmul.f32 %v161_v33, %v146_v44  ;;  %v181_v9 = vmul.f32 %v161_v33, %v150_v45  ;;  %v182_v10 = vmul.f32 %v161_v33, %v154_v47 }
  0x87   :  { %v919_v11 = vmul.f32 %v253_v34, %v890_v48  ;;  %v922_v14 = vmul.f32 %v253_v34, %v892_v49  ;;  %v925_v15 = vmul.f32 %v253_v34, %v894_v50  ;;  %v928_v17 = vmul.f32 %v253_v34, %v896_v52 }
  0x89   :  { %v165_v51 = vpop.permute.xlu1 %164 }
  0x8a   :  { %v329_v56 = vpop.permute.xlu0 %328  ;;  %v175_v18 = vmul.f32 %v165_v51, %v142_v43  ;;  %v176_v21 = vmul.f32 %v165_v51, %v146_v44  ;;  %v183_v22 = vmul.f32 %v165_v51, %v150_v45  ;;  %v184_v25 = vmul.f32 %v165_v51, %v154_v47 }
  0x8b   :  { %v935_v26 = vmul.f32 %v329_v56, %v898_v53  ;;  %v938_v27 = vmul.f32 %v329_v56, %v900_v54  ;;  %v941_v28 = vmul.f32 %v329_v56, %v902_v55  ;;  %v350_v30 = vmul.f32 %v329_v56, %v904_v57 }
  0x8d   :  { %v169_v5 = vpop.permute.xlu1 %168 }
  0x8e   :  { %v944_v31 = vmul.f32 %v169_v5, %v142_v43  ;;  %v950_v39 = vmul.f32 %v169_v5, %v146_v44  ;;  %v185_v40 = vmul.f32 %v169_v5, %v150_v45  ;;  %v186_v46 = vmul.f32 %v169_v5, %v154_v47 }
  0x8f   :  { %v86_v16 = vpop.permute.xlu0 %85 }
  0x90   :  { %v103_v19 = vmul.f32 %v86_v16, %v906_v58  ;;  %v104_v20 = vmul.f32 %v86_v16, %v908_v59  ;;  %v111_v23 = vmul.f32 %v86_v16, %v910_v60  ;;  %v112_v24 = vmul.f32 %v86_v16, %v912_v0 }
  0x92   :  { %v245_v29 = vpop.permute.xlu1 %244  ;;  %v187_v32 = vadd.f32 %v171_v61, %v103_v19  ;;  %v188_v33 = vadd.f32 %v172_v62, %v104_v20  ;;  %v195_v41 = vadd.f32 %v179_v63, %v111_v23  ;;  %v196_v42 = vadd.f32 %v180_v1, %v112_v24 }
  0x93   :  { %v91_v34 = vpop.permute.xlu0 %90  ;;  %v257_v43 = vmul.f32 %v245_v29, %v890_v48  ;;  %v258_v51 = vmul.f32 %v245_v29, %v892_v49  ;;  %v265_v56 = vmul.f32 %v245_v29, %v894_v50  ;;  %v266_v62 = vmul.f32 %v245_v29, %v896_v52 }
  0x94   :  { %v105_v35 = vmul.f32 %v91_v34, %v906_v58  ;;  %v106_v36 = vmul.f32 %v91_v34, %v908_v59  ;;  %v113_v37 = vmul.f32 %v91_v34, %v910_v60  ;;  %v114_v38 = vmul.f32 %v91_v34, %v912_v0 }
  0x95   :  { %v271_v45 = vadd.f32 %v255_v2, %v187_v32  ;;  %v272_v63 = vadd.f32 %v256_v3, %v188_v33  ;;  %v279_v5 = vadd.f32 %v263_v4, %v195_v41  ;;  %v280_v23 = vadd.f32 %v264_v6, %v196_v42 }
  0x96   :  { %v249_v61 = vpop.permute.xlu1 %248  ;;  %v189_v16 = vadd.f32 %v173_v7, %v105_v35  ;;  %v197_v19 = vadd.f32 %v181_v9, %v113_v37  ;;  %v198_v20 = vadd.f32 %v182_v10, %v114_v38  ;;  %v190_v34 = vadd.f32 %v174_v8, %v106_v36 }
  0x97   :  { %v96_v12 = vpop.permute.xlu0 %95  ;;  %v958_v47 = vmul.f32 %v249_v61, %v890_v48  ;;  %v961_v1 = vmul.f32 %v249_v61, %v892_v49  ;;  %v267_v24 = vmul.f32 %v249_v61, %v894_v50  ;;  %v268_v10 = vmul.f32 %v249_v61, %v896_v52 }
  0x98   :  { %v107_v44 = vmul.f32 %v96_v12, %v906_v58  ;;  %v108_v7 = vmul.f32 %v96_v12, %v908_v59  ;;  %v115_v9 = vmul.f32 %v96_v12, %v910_v60  ;;  %v116_v8 = vmul.f32 %v96_v12, %v912_v0 }
  0x99   :  { %v281_v29 = vadd.f32 %v265_v56, %v197_v19  ;;  %v282_v48 = vadd.f32 %v266_v62, %v198_v20  ;;  %v273_v32 = vadd.f32 %v257_v43, %v189_v16  ;;  %v274_v6 = vadd.f32 %v258_v51, %v190_v34 }
  0x9a   :  { %v191_v33 = vadd.f32 %v175_v18, %v107_v44  ;;  %v192_v52 = vadd.f32 %v176_v21, %v108_v7  ;;  %v199_v37 = vadd.f32 %v183_v22, %v115_v9  ;;  %v200_v38 = vadd.f32 %v184_v25, %v116_v8 }
  0x9b   :  { %v101_v2 = vpop.permute.xlu0 %100  ;;  %v325_v3 = vpop.permute.xlu1 %324  ;;  %v365_v62 = vadd.f32 %v941_v28, %v281_v29  ;;  %v366_v16 = vadd.f32 %v350_v30, %v282_v48  ;;  %v357_v21 = vadd.f32 %v935_v26, %v273_v32  ;;  %v358_v44 = vadd.f32 %v938_v27, %v274_v6 }
  0x9c   :  { %v117_v49 = vmul.f32 %v101_v2, %v910_v60  ;;  %v118_v4 = vmul.f32 %v101_v2, %v912_v0  ;;  %v339_v50 = vmul.f32 %v325_v3, %v898_v53  ;;  %v340_v35 = vmul.f32 %v325_v3, %v900_v54 }
  0x9d   :  { %v347_v36 = vmul.f32 %v325_v3, %v902_v55  ;;  %v348_v12 = vmul.f32 %v325_v3, %v904_v57  ;;  %v109_v41 = vmul.f32 %v101_v2, %v906_v58  ;;  %v110_v19 = vmul.f32 %v101_v2, %v908_v59 }
  0x9e   :  { %v355_v43 = vadd.f32 %v339_v50, %v271_v45  ;;  %v356_v60 = vadd.f32 %v340_v35, %v272_v63  ;;  %v201_v51 = vadd.f32 %v185_v40, %v117_v49  ;;  %v202_v61 = vadd.f32 %v186_v46, %v118_v4 }
  0x9f   :  { %v374_v42 = vpop.permute.xlu0 %373  ;;  %v333_v18 = vpop.permute.xlu1 %332  ;;  %v363_v56 = vadd.f32 %v347_v36, %v279_v5  ;;  %v364_v0 = vadd.f32 %v348_v12, %v280_v23  ;;  %v193_v22 = vadd.f32 %v944_v31, %v109_v41  ;;  %v194_v31 = vadd.f32 %v950_v39, %v110_v19 }
  0xa0   :  { %v391_v20 = vadd.f32 %v374_v42, %v355_v43  ;;  %v392_v34 = vadd.f32 %v374_v42, %v356_v60  ;;  %v351_v58 = vmul.f32 %v333_v18, %v902_v55  ;;  %v352_v25 = vmul.f32 %v333_v18, %v904_v57 }
  0xa1   :  { %v399_v63 = vadd.f32 %v374_v42, %v363_v56  ;;  %v400_v28 = vadd.f32 %v374_v42, %v364_v0  ;;  %v285_v5 = vadd.f32 %v925_v15, %v201_v51  ;;  %v286_v26 = vadd.f32 %v928_v17, %v202_v61 }
  0xa2   :  { %v407_v40 = vmax.f32 %v391_v20, 0.0  ;;  %v408_v46 = vmax.f32 %v392_v34, 0.0  ;;  %v343_v23 = vmul.f32 %v333_v18, %v898_v53  ;;  %v344_v7 = vmul.f32 %v333_v18, %v900_v54 }
  0xa3   :  { %v337_v45 = vpop.permute.xlu1 %336  ;;  %v283_v9 = vadd.f32 %v267_v24, %v199_v37  ;;  %v284_v8 = vadd.f32 %v268_v10, %v200_v38  ;;  %v416_v15 = vmax.f32 %v400_v28, 0.0  ;;  %v275_v39 = vadd.f32 %v958_v47, %v191_v33  ;;  %v389_v4 = vpop.permute.xlu0 %388  ;;  %v562_v28 = vld [vmem:[%s1065_s5 + $0x10] sm:$0xff] }
  0xa4   :  { %v353_v30 = vmul.f32 %v337_v45, %v902_v55  ;;  %v354_v59 = vmul.f32 %v337_v45, %v904_v57  ;;  %v423_v27 = vadd.f32 %v408_v46, %v407_v40  ;;  %v345_v29 = vmul.f32 %v337_v45, %v898_v53  ;;  %v560_v46 = vld [vmem:[%s1065_s5] sm:$0xff] }
  0xa5   :  { %v346_v55 = vmul.f32 %v337_v45, %v900_v54  ;;  %v415_v57 = vmax.f32 %v399_v63, 0.0  ;;  %v367_v17 = vadd.f32 %v351_v58, %v283_v9  ;;  %v368_v32 = vadd.f32 %v352_v25, %v284_v8  ;;  %v561_v63 = vld [vmem:[%s1065_s5 + $0x8] sm:$0xff] }
  0xa6   :  { %v369_v2 = vadd.f32 %v353_v30, %v285_v5  ;;  %v370_v3 = vadd.f32 %v354_v59, %v286_v26  ;;  %424 = vadd.xlane.f32.xlu1 %v423_v27  ;;  %v276_v49 = vadd.f32 %v961_v1, %v192_v52  ;;  %v277_v53 = vadd.f32 %v919_v11, %v193_v22  ;;  %v563_v5 = vld [vmem:[%s1065_s5 + $0x18] sm:$0xff] }
  0xa7   :  { %v278_v54 = vadd.f32 %v922_v14, %v194_v31  ;;  %v359_v18 = vadd.f32 %v343_v23, %v275_v39  ;;  %v435_v14 = vadd.f32 %v416_v15, %v415_v57  ;;  %v798_v30 = vmov 0.0|0.0  }
  0xa8   :  { %v379_v48 = vpop.permute.xlu1 %378  ;;  %v405_v35 = vadd.f32 %v389_v4, %v369_v2  ;;  %v406_v36 = vadd.f32 %v389_v4, %v370_v3  ;;  %v360_v47 = vadd.f32 %v344_v7, %v276_v49  ;;  %v361_v33 = vadd.f32 %v345_v29, %v277_v53  ;;  %699 = vmatprep.subr.bf16.mxu0 %v798_v30 }
  0xa9   :  { %v401_v6 = vadd.f32 %v379_v48, %v365_v62  ;;  %v402_v24 = vadd.f32 %v379_v48, %v366_v16  ;;  %v393_v10 = vadd.f32 %v379_v48, %v357_v21  ;;  %v394_v50 = vadd.f32 %v379_v48, %v358_v44 }
  0xaa   :  { %v362_v1 = vadd.f32 %v346_v55, %v278_v54  ;;  %v421_v62 = vmax.f32 %v405_v35, 0.0  ;;  %v422_v16 = vmax.f32 %v406_v36, 0.0  ;;  %v397_v19 = vadd.f32 %v389_v4, %v361_v33 }
  0xab   :  { %v417_v12 = vmax.f32 %v401_v6, 0.0  ;;  %v418_v37 = vmax.f32 %v402_v24, 0.0  ;;  %v409_v38 = vmax.f32 %v393_v10, 0.0  ;;  %v410_v41 = vmax.f32 %v394_v50, 0.0 }
  0xac   :  { %v384_v42 = vpop.permute.xlu1 %383  ;;  %v398_v22 = vadd.f32 %v389_v4, %v362_v1  ;;  %v444_v58 = vadd.f32 %v422_v16, %v421_v62  ;;  %v413_v44 = vmax.f32 %v397_v19, 0.0  ;;  %v700_v59 = vpack.c.bf16 %v561_v63, %v560_v46  ;;  %v680_v46 = vld [vmem:[%s1063_s3] ss:$0 sm:$0xff] }
  0xad   :  { %v438_v52 = vadd.f32 %v418_v37, %v417_v12  ;;  %v426_v43 = vadd.f32 %v410_v41, %v409_v38  ;;  %v403_v60 = vadd.f32 %v384_v42, %v367_v17  ;;  %v404_v56 = vadd.f32 %v384_v42, %v368_v32 }
  0xae   :  { %v395_v0 = vadd.f32 %v384_v42, %v359_v18  ;;  %v396_v51 = vadd.f32 %v384_v42, %v360_v47  ;;  %v414_v45 = vmax.f32 %v398_v22, 0.0  ;;  %v799_v26 = vmov 0.0   ;;  %701 = vmatpush3.bf16.msra.mxu0 %v700_v59 }
  0xaf   :  { %439 = vadd.xlane.f32.xlu1 %v438_v52  ;;  %427 = vadd.xlane.f32.xlu0 %v426_v43  ;;  %v419_v11 = vmax.f32 %v403_v60, 0.0  ;;  %v420_v61 = vmax.f32 %v404_v56, 0.0  ;;  %33 = vst.msk [vmem:[#allocation2] sm:$0x3] %vm32_vm0, %v799_v26  ;;  %v703_v31 = vpack.c.bf16 %v563_v5, %v562_v28  ;;  %v1070_v7 = vlaneseq  ;;  %v681_v28 = vld [vmem:[%s1064_s4] ss:$0 sm:$0xff] }
  0xb0   :  { %v411_v34 = vmax.f32 %v395_v0, 0.0  ;;  %v412_v21 = vmax.f32 %v396_v51, 0.0  ;;  %v432_v40 = vadd.f32 %v414_v45, %v413_v44  ;;  %702 = vmatprep.subr.bf16.mxu0 %v798_v30  ;;  %696 = vmatprep.mubr.msk.f32.mxu0 %vm800_vm1, %v799_v26 }
  0xb1   :  { %v441_v20 = vadd.f32 %v420_v61, %v419_v11  ;;  %v464_v27 = vand.u32 127, %v1070_v7 }
  0xb2   :  { %v429_v25 = vadd.f32 %v412_v21, %v411_v34  ;;  %704 = vmatpush3.bf16.msra.mxu0 %v703_v31 }
  0xb3   :  { %436 = vadd.xlane.f32.xlu0 %v435_v14  ;;  %442 = vadd.xlane.f32.xlu1 %v441_v20  ;;  %v469_v2 = vadd.s32 4294967288, %v464_v27  ;;  %v476_v3 = vadd.s32 4294967280, %v464_v27  ;;  %v483_v29 = vadd.s32 4294967272, %v464_v27  ;;  %v467_v15 = vsub.s32 %v464_v27, %v874_v13 }
  0xb5   :  { %v472_v48 = vsub.s32 %v469_v2, %v874_v13  ;;  %v479_v17 = vsub.s32 %v476_v3, %v874_v13  ;;  %v486_v39 = vsub.s32 %v483_v29, %v874_v13 }
  0xb6   :  { %v34_v42 = vld [vmem:[#allocation2] sm:$0x3] }
  0xb7   :  { %445 = vadd.xlane.f32.xlu1 %v444_v58  ;;  %430 = vadd.xlane.f32.xlu0 %v429_v25 }
  0xbb   :  { %433 = vadd.xlane.f32.xlu0 %v432_v40 }
 0x133   :  { %v425_v23 = vpop.xlane.xlu1 %424 }
 0x134   :  { %v468_v35 = vrot.slane %v425_v23, %v467_v15 }
 0x13c   :  { %v428_v9 = vpop.xlane.xlu0 %427  ;;  %v440_v8 = vpop.xlane.xlu1 %439 }
 0x13d   :  { %v473_v6 = vrot.slane %v428_v9, %v472_v48  ;;  %v497_v24 = vrot.slane %v440_v8, %v472_v48 }
 0x13f   :  { %v475_v12 = vsel %vm474_vm2, %v473_v6, %v468_v35 }
 0x140   :  { %v437_v55 = vpop.xlane.xlu0 %436  ;;  %v443_v57 = vpop.xlane.xlu1 %442 }
 0x141   :  { %v493_v32 = vrot.slane %v437_v55, %v467_v15  ;;  %v502_v10 = vrot.slane %v443_v57, %v479_v17 }
 0x143   :  { %v498_v36 = vsel %vm474_vm2, %v497_v24, %v493_v32 }
 0x144   :  { %v431_v49 = vpop.xlane.xlu0 %430  ;;  %v446_v4 = vpop.xlane.xlu1 %445  ;;  %v503_v38 = vsel %vm481_vm3, %v502_v10, %v498_v36 }
 0x145   :  { %v480_v50 = vrot.slane %v431_v49, %v479_v17  ;;  %v507_v53 = vrot.slane %v446_v4, %v486_v39 }
 0x147   :  { %v482_v41 = vsel %vm481_vm3, %v480_v50, %v475_v12  ;;  %v508_v13 = vsel %vm488_vm4, %v507_v53, %v503_v38 }
 0x148   :  { %v434_v54 = vpop.xlane.xlu0 %433 }
 0x149   :  { %v487_v37 = vrot.slane %v434_v54, %v486_v39 }
 0x14b   :  { %v489_v18 = vsel %vm488_vm4, %v487_v37, %v482_v41 }
 0x14c   :  { %v510_v47 = vsel %vm509_vm5, %v508_v13, %v489_v18 }
 0x14d   :  { %v512_v33 = vadd.f32 %v510_v47, %v34_v42 }
 0x14f   :  { %514 = vst.msk [vmem:[#allocation2] sm:$0x3] %vm32_vm0, %v512_v33 }
 0x156   :  { %v518_v1 = vld [vmem:[#allocation2] sm:$0x3] }
 0x157   :  { %v519_v52 = vmul.f32 0.00390625, %v518_v1 }
 0x159   :  { %v521_v43 = vsel %vm32_vm0, %v519_v52, 0.0  ;;  %520 = vst.msk [vmem:[#allocation2] sm:$0x3] %vm32_vm0, %v519_v52 }
 0x15a   :  { %v522_v60 = vrot.slane %v521_v43, 4 }
 0x15c   :  { %v523_v56 = vadd.f32 %v522_v60, %v521_v43 }
 0x15e   :  { %v524_v0 = vrot.slane %v523_v56, 2 }
 0x160   :  { %v525_v51 = vadd.f32 %v524_v0, %v523_v56 }
 0x162   :  { %v526_v11 = vrot.slane %v525_v51, 1 }
 0x164   :  { %v527_v61 = vadd.f32 %v526_v11, %v525_v51 }
 0x166   :  { %v529_v14 = vmul.f32 0.5, %v527_v61 }
 0x168   :  { %v530_v62 = vsub.f32 %v519_v52, %v529_v14 }
 0x16a   :  { %v531_v16 = vmul.f32 %v530_v62, %v530_v62 }
 0x16c   :  { %v532_v19 = vsel %vm32_vm0, %v531_v16, 0.0 }
 0x16d   :  { %v533_v20 = vrot.slane %v532_v19, 4 }
 0x16f   :  { %v534_v34 = vadd.f32 %v533_v20, %v532_v19 }
 0x171   :  { %v535_v21 = vrot.slane %v534_v34, 2 }
 0x173   :  { %v536_v22 = vadd.f32 %v535_v21, %v534_v34 }
 0x175   :  { %v537_v58 = vrot.slane %v536_v22, 1 }
 0x177   :  { %v538_v25 = vadd.f32 %v537_v58, %v536_v22 }
 0x179   :  { %v539_v44 = vmul.f32 0.5, %v538_v25 }
 0x17b   :  { %v540_v45 = vadd.f32 1e-05, %v539_v44 }
 0x17d   :  { %722 = vrsqrt.f32 %v540_v45 }
 0x187   :  { %v723_v40 = vpop.eup %722 }
 0x188   :  { %v542_v63 = vmul.f32 %v723_v40, %v530_v62 }
 0x18a   :  { %v550_v30 = vmul.f32 %v680_v46, %v542_v63 }
 0x18c   :  { %v558_v59 = vadd.f32 %v681_v28, %v550_v30 }
 0x18e   :  { %697 = vmatmul.mubr.msk.f32.vlgmr.msra.gmra.mrb[0].mxu0 %vm564_vm6, %v558_v59  ;;  %559 = vst.msk [vmem:[#allocation4] sm:$0x3] %vm32_vm0, %v558_v59 }
 0x18f   :  { %735 = shalt.err (!%p732_p4)
}
 0x190   :  { %s736_s15 = scalar_lea.hbm %s1067_s7, 32 }
 0x191   :  { %p737_p5 = scmp.ne.s32.totalorder %s1067_s7, %s736_s15  ;;  %p740_p6 = scmp.lt.u32.totalorder %s736_s15, %s1067_s7 }
 0x193   :  { %p742_p7 = pnand %p740_p6, %p737_p5 }
 0x195   :  { %745 = shalt.err (!%p742_p7)
}
 0x196   :  { %658 = dma.vmem_to_hbm [thread:$0]  %s656_s12, 32, %s1067_s7, [#allocation5]  }
 0x197   :  { %s746_s22 = scalar_lea.vmem %s646_s14, 32  ;;  %p751_p9 = scmp.lt.s32.totalorder %s646_s14, %s646_s14 }
 0x198   :  { %p747_p8 = scmp.ne.s32.totalorder %s646_s14, %s746_s22  ;;  %p752_p10 = scmp.lt.s32.totalorder %s746_s22, %s746_s22 }
 0x19a   :  { %p753_p11 = por %p752_p10, %p751_p9 }
 0x19c   :  { %p754_p12 = pnand %p753_p11, %p747_p8 }
 0x19e   :  { %757 = shalt.err (!%p754_p12)
}
 0x19f   :  { %s758_s2 = scalar_lea.hbm %s1066_s6, 32 }
 0x1a0   :  { %p759_p13 = scmp.ne.s32.totalorder %s1066_s6, %s758_s2  ;;  %p762_p0 = scmp.lt.u32.totalorder %s758_s2, %s1066_s6 }
 0x1a2   :  { %p764_p1 = pnand %p762_p0, %p759_p13 }
 0x1a4   :  { %767 = shalt.err (!%p764_p1)
}
 0x1a5   :  { %648 = dma.vmem_to_hbm [thread:$0]  %s646_s14, 32, %s1066_s6, [#allocation3]  }
 0x1a6   :  { %s803_s29 = smov [#allocation6]  }
 0x1a7   :  { %s665_s5 = sshll.u32 %s803_s29, 4  ;;  %s666_s5 = int_to_ptr.vmem [resolvable:$true] %s665_s5 }
 0x1a8   :  { %s768_s30 = scalar_lea.vmem %s666_s5, 32  ;;  %p773_p3 = scmp.lt.s32.totalorder %s666_s5, %s666_s5 }
 0x1a9   :  { %p769_p2 = scmp.ne.s32.totalorder %s666_s5, %s768_s30  ;;  %p774_p4 = scmp.lt.s32.totalorder %s768_s30, %s768_s30 }
 0x1ab   :  { %p775_p5 = por %p774_p4, %p773_p3 }
 0x1ad   :  { %p776_p6 = pnand %p775_p5, %p769_p2 }
 0x261   :  { %v634_v5 = vpop.f32.mrb[0].mxu0 }
 0x262   :  { %638 = vst [vmem:[#allocation6] sm:$0x3] %v634_v5  ;;  %v698_v26 = vpop.f32.mrb[1].mxu0 }
 0x263   :  { %779 = shalt.err (!%p776_p6)
}
 0x264   :  { %s780_s11 = scalar_lea.hbm %s1068_s8, 32 }
 0x265   :  { %p781_p7 = scmp.ne.s32.totalorder %s1068_s8, %s780_s11  ;;  %p784_p8 = scmp.lt.u32.totalorder %s780_s11, %s1068_s8 }
 0x267   :  { %p786_p9 = pnand %p784_p8, %p781_p7 }
 0x269   :  { %789 = shalt.err (!%p786_p9)
}
 0x26a   :  { %668 = dma.vmem_to_hbm [thread:$0]  %s666_s5, 32, %s1068_s8, [#allocation5]  }
 0x26b   :  { %790 = dma.done.wait [#allocation3], 32  }
 0x26c   :  { %791 = vsyncadd [#allocation3], 4294967264 }
 0x26d   :  { %792 = dma.done.wait [#allocation5], 64  }
 0x26e   :  { %793 = vsyncadd [#allocation5], 4294967232 }
 0x26f   :  { %678 = vsyncpa [#allocation3], 1 }
 0x270   :  { %679 = vsyncpa [#allocation5], 1 }

</bundles_post_ra>
